<compile_context>
chip_gen: v6e
topology: v6e:2x2x1
jax: 0.10.0
libtpu: 0.0.40
codegen_flags: <defaults>
</compile_context>

<pallas_src>
import functools

import jax
import jax.numpy as jnp
import numpy as np
from jax import lax
from jax.experimental import pallas as pl
from jax.experimental.pallas import tpu as pltpu

EPS = 1e-5


# ---------------- Fused Pallas kernel ----------------

def fused_forward_kernel(x_ref, dw_ref, pw_ref, pwb_ref, wout_ref, bout_ref,
                         out_ref, xpad_ref, *, kernel_size, heads, dim_head):
    """Whole ConvolutionalProjection forward for one batch element.

    x_ref   : (H, W, C)        unpadded NHWC activation tile
    dw_ref  : (K*K, 3C)        BN-folded depthwise weights; row r = dy*K+dx,
                               channels = [q (C) | k (C) | v (C)]
    pw_ref  : (3C, 3O)         block-diagonal folded pointwise weights
    pwb_ref : (1, 3O)          folded pointwise bias
    wout_ref: (heads, dh, dim) to_out weight, split per head (folds 'b h n d -> b n (h d)')
    bout_ref: (1, dim)         to_out bias
    out_ref : (N, dim)         final output tile
    xpad_ref: (Hp, Wp, 3C)     VMEM scratch holding the zero-padded, lane-replicated tile
    """
    K = kernel_size
    H, W, C = x_ref.shape
    pad = (K - 1) // 2
    N = H * W
    inner = heads * dim_head
    dim_out = out_ref.shape[-1]

    # ---- in-kernel zero padding: zero the halo, write the interior (no jnp.pad in HBM).
    xpad_ref[...] = jnp.zeros_like(xpad_ref)
    xv = x_ref[...]
    # Replicate channels once ([x | x | x]) so a single (H, W, 3C) accumulator serves
    # the q/k/v depthwise branches.
    xpad_ref[pad:pad + H, pad:pad + W, :] = jnp.concatenate([xv, xv, xv], axis=-1)

    # ---- fused q/k/v depthwise KxK stencil on the VPU, one wide accumulator.
    dw = dw_ref[...]                                   # (K*K, 3C)
    acc = jnp.zeros((H, W, 3 * C), jnp.float32)
    for dy in range(K):                                # static stencil; taps loaded once
        for dx in range(K):
            tap = xpad_ref[dy:dy + H, dx:dx + W, :]    # (H, W, 3C)
            acc = acc + tap * dw[dy * K + dx, :]
    # TODO(synk): at larger img_size, replace the dx (sublane-offset) slices with
    #             pltpu.roll(axis=1) + an aligned [:W] slice; negligible at 8x8.

    # ---- fused q/k/v pointwise conv (single MXU matmul, block-diagonal weights).
    stacked = acc.reshape(N, 3 * C)
    qkv = jnp.dot(stacked, pw_ref[...],
                  preferred_element_type=jnp.float32) + pwb_ref[...]   # (N, 3*inner)

    # ---- multi-head attention + to_out, entirely in registers/VMEM.
    # Softmax scale is pre-folded into the q-branch pointwise weights/bias.
    acc_o = jnp.zeros((N, dim_out), jnp.float32)
    for h in range(heads):                             # heads is small; static unroll
        lo = h * dim_head
        q = qkv[:, lo:lo + dim_head]
        k = qkv[:, inner + lo:inner + lo + dim_head]
        v = qkv[:, 2 * inner + lo:2 * inner + lo + dim_head]
        dots = jnp.dot(q, k.T, preferred_element_type=jnp.float32)
        dots = dots - jnp.max(dots, axis=-1, keepdims=True)
        p = jnp.exp(dots)
        l = jnp.sum(p, axis=-1, keepdims=True)
        attn = p * pl.reciprocal(l, approx=True)
        o_h = jnp.dot(attn, v, preferred_element_type=jnp.float32)     # (N, dh)
        # 'b h n d -> b n (h d)' + to_out Linear as a split contraction (no concat).
        acc_o = acc_o + jnp.dot(o_h, wout_ref[h], preferred_element_type=jnp.float32)
    # TODO(synk): for large N (later CvT stages) add flash-style KV tiling + explicit
    #             vmem_limit_bytes before the (N, N) score matrices stress v7x's 64 MiB.
    out_ref[...] = acc_o + bout_ref[...]


# ---------------- Pallas wrapper (glue) ----------------

def conv_projection_forward(x, fp, *, img_size, heads, dim_head, kernel_size):
    """Pallas implementation of ConvolutionalProjection.forward (last_stage=False)."""
    B, N, dim = x.shape
    inner_dim = heads * dim_head
    C, O = dim, inner_dim
    pad = (kernel_size - 1) // 2
    Hp = Wp = img_size + 2 * pad

    # rearrange 'b (l w) c -> b l w c' (free, row-major); padding happens in-kernel.
    x_nhwc = x.reshape(B, img_size, img_size, dim)

    out = pl.pallas_call(
        functools.partial(fused_forward_kernel, kernel_size=kernel_size,
                          heads=heads, dim_head=dim_head),
        out_shape=jax.ShapeDtypeStruct((B, N, dim), jnp.float32),
        grid=(B,),
        in_specs=[
            pl.BlockSpec((None, img_size, img_size, C), lambda b: (b, 0, 0, 0)),
            pl.BlockSpec((kernel_size * kernel_size, 3 * C), lambda b: (0, 0)),
            pl.BlockSpec((3 * C, 3 * O), lambda b: (0, 0)),
            pl.BlockSpec((1, 3 * O), lambda b: (0, 0)),
            pl.BlockSpec((heads, dim_head, dim), lambda b: (0, 0, 0)),
            pl.BlockSpec((1, dim), lambda b: (0, 0)),
        ],
        out_specs=pl.BlockSpec((None, N, dim), lambda b: (b, 0, 0)),
        scratch_shapes=[pltpu.VMEM((Hp, Wp, 3 * C), jnp.float32)],
        compiler_params=pltpu.CompilerParams(dimension_semantics=("parallel",)),
    )(x_nhwc, fp["dw_all"], fp["pw_cat"], fp["pwb_cat"], fp["out_w"], fp["out_b"])
    return out


# ---------------- Parameter init (torch shapes) + folding ----------------

def init_params(key, dim, inner_dim, kernel_size):
    """Returns torch-layout parameters (used by both the reference and the folder)."""
    ks = jax.random.split(key, 8)

    def mk(k, shape, s=0.1):
        return jax.random.normal(k, shape, jnp.float32) * s

    def conv_branch(k):
        sk = jax.random.split(k, 8)
        return dict(
            dw_w=mk(sk[0], (dim, 1, kernel_size, kernel_size)),   # torch (C,1,K,K)
            dw_b=mk(sk[1], (dim,)),
            gamma=1.0 + mk(sk[2], (dim,)),
            beta=mk(sk[3], (dim,)),
            mean=mk(sk[4], (dim,)),
            var=1.0 + jnp.abs(mk(sk[5], (dim,))),
            pw_w=mk(sk[6], (inner_dim, dim, 1, 1)),               # torch (O,C,1,1)
            pw_b=mk(sk[7], (inner_dim,)),
        )

    return dict(
        q=conv_branch(ks[0]), k=conv_branch(ks[1]), v=conv_branch(ks[2]),
        out_w=mk(ks[3], (dim, inner_dim)),                        # torch Linear (out, in)
        out_b=mk(ks[4], (dim,)),
    )


def convert_params(tp, *, dim, inner_dim, heads, dim_head, kernel_size):
    """Fold BN + depthwise bias (+ softmax scale for q) into fused Pallas params."""
    K = kernel_size
    scale = dim_head ** (-0.5)

    def fold_branch(p, extra_scale):
        dw = jnp.transpose(p["dw_w"][:, 0], (1, 2, 0))            # (K, K, C)
        bn_scale = p["gamma"] / jnp.sqrt(p["var"] + EPS)          # (C,)
        bn_shift = p["beta"] - p["mean"] * bn_scale               # (C,)
        dw_folded = dw * bn_scale                                 # per-channel fold
        bias_vec = p["dw_b"] * bn_scale + bn_shift                # (C,)
        pw = jnp.transpose(p["pw_w"][:, :, 0, 0])                 # (C, O)
        pw_b = p["pw_b"] + bias_vec @ pw                          # (O,)
        return (dw_folded.reshape(K * K, dim),
                pw * extra_scale,
                pw_b * extra_scale)

    dwq, pwq, pbq = fold_branch(tp["q"], scale)   # softmax scale folded into q branch
    dwk, pwk, pbk = fold_branch(tp["k"], 1.0)
    dwv, pwv, pbv = fold_branch(tp["v"], 1.0)

    # NOTE: block-diagonal pw_cat is only MXU-efficient while 3C fits one contraction
    # pass (<=128 on v5e / <=256 on v6e,v7x); switch to 3 separate (C,O) matmuls beyond.
    return dict(
        dw_all=jnp.concatenate([dwq, dwk, dwv], axis=1),                  # (K*K, 3C)
        pw_cat=jax.scipy.linalg.block_diag(pwq, pwk, pwv),                # (3C, 3O)
        pwb_cat=jnp.concatenate([pbq, pbk, pbv])[None, :],                # (1, 3O)
        out_w=jnp.transpose(tp["out_w"]).reshape(heads, dim_head, dim),   # (h, dh, dim)
        out_b=tp["out_b"][None, :],                                       # (1, dim)
    )


# ---------------- Pure-JAX reference (torch semantics, NCHW) ----------------

def ref_forward(x, tp, *, img_size, heads, dim_head, dim):
    B, N, _ = x.shape
    inner_dim = heads * dim_head
    scale = dim_head ** (-0.5)
    x_nchw = jnp.transpose(x.reshape(B, img_size, img_size, dim), (0, 3, 1, 2))

    def custom_conv(xc, p):
        C = xc.shape[1]
        pad = (p["dw_w"].shape[-1] - 1) // 2
        dw = lax.conv_general_dilated(
            xc, p["dw_w"], (1, 1), [(pad, pad), (pad, pad)],
            feature_group_count=C,
            dimension_numbers=("NCHW", "OIHW", "NCHW"))
        dw = dw + p["dw_b"][None, :, None, None]
        bn = ((dw - p["mean"][None, :, None, None])
              / jnp.sqrt(p["var"][None, :, None, None] + EPS)
              * p["gamma"][None, :, None, None]
              + p["beta"][None, :, None, None])
        pw = lax.conv_general_dilated(
            bn, p["pw_w"], (1, 1), [(0, 0), (0, 0)],
            dimension_numbers=("NCHW", "OIHW", "NCHW"))
        return pw + p["pw_b"][None, :, None, None]

    def to_bhnd(t):  # 'b (h d) l w -> b h (l w) d'
        Bb, _, H, W = t.shape
        return t.reshape(Bb, heads, dim_head, H * W).transpose(0, 1, 3, 2)

    q = to_bhnd(custom_conv(x_nchw, tp["q"]))
    v = to_bhnd(custom_conv(x_nchw, tp["v"]))
    k = to_bhnd(custom_conv(x_nchw, tp["k"]))

    dots = jnp.einsum("bhid,bhjd->bhij", q, k) * scale
    attn = jax.nn.softmax(dots, axis=-1)
    out = jnp.einsum("bhij,bhjd->bhid", attn, v)
    out = out.transpose(0, 2, 1, 3).reshape(B, N, inner_dim)
    return jnp.einsum("bni,oi->bno", out, tp["out_w"]) + tp["out_b"]


# ---------------- main ----------------

if __name__ == "__main__":
    dim, img_size, heads, dim_head, kernel_size = 32, 8, 2, 8, 3
    B = 2
    N = img_size * img_size
    inner_dim = heads * dim_head

    key = jax.random.PRNGKey(0)
    kx, kp = jax.random.split(key)
    x = jax.random.normal(kx, (B, N, dim), jnp.float32)

    torch_params = init_params(kp, dim, inner_dim, kernel_size)
    fused_params = convert_params(torch_params, dim=dim, inner_dim=inner_dim,
                                  heads=heads, dim_head=dim_head,
                                  kernel_size=kernel_size)

    out = conv_projection_forward(x, fused_params, img_size=img_size,
                                  heads=heads, dim_head=dim_head,
                                  kernel_size=kernel_size)
    out = jax.block_until_ready(out)

    ref = ref_forward(x, torch_params, img_size=img_size, heads=heads,
                      dim_head=dim_head, dim=dim)
    np.testing.assert_allclose(np.asarray(out), np.asarray(ref),
                               atol=1e-3, rtol=1e-3)
    print("KERNEL_OK")
</pallas_src>

<mosaic_0001>
module attributes {stable_mosaic.version = 11 : i64} {
  func.func @fused_forward_kernel(%arg0: i32, %arg1: memref<1x8x8x32xf32, #tpu.memory_space<vmem>>, %arg2: memref<9x96xf32, #tpu.memory_space<vmem>>, %arg3: memref<96x48xf32, #tpu.memory_space<vmem>>, %arg4: memref<1x48xf32, #tpu.memory_space<vmem>>, %arg5: memref<2x8x32xf32, #tpu.memory_space<vmem>>, %arg6: memref<1x32xf32, #tpu.memory_space<vmem>>, %arg7: memref<1x64x32xf32, #tpu.memory_space<vmem>>, %arg8: memref<10x10x96xf32, #tpu.memory_space<vmem>>) attributes {dimension_semantics = [#tpu.dimension_semantics<parallel>], iteration_bounds = array<i64: 2>, scalar_prefetch = 0 : i64, scratch_operands = 1 : i64, tpu.core_type = #tpu.core_type<tc>, window_params = [{transform_indices = @transform_0, window_bounds = array<i64: 1, 8, 8, 32>}, {pipeline_mode = #tpu.pipeline_mode<synchronous>, transform_indices = @transform_1, window_bounds = array<i64: 9, 96>}, {pipeline_mode = #tpu.pipeline_mode<synchronous>, transform_indices = @transform_2, window_bounds = array<i64: 96, 48>}, {pipeline_mode = #tpu.pipeline_mode<synchronous>, transform_indices = @transform_3, window_bounds = array<i64: 1, 48>}, {pipeline_mode = #tpu.pipeline_mode<synchronous>, transform_indices = @transform_4, window_bounds = array<i64: 2, 8, 32>}, {pipeline_mode = #tpu.pipeline_mode<synchronous>, transform_indices = @transform_5, window_bounds = array<i64: 1, 32>}, {transform_indices = @transform_6, window_bounds = array<i64: 1, 64, 32>}]} {
    %cst = arith.constant 0.000000e+00 : f32
    %0 = vector.broadcast %cst : f32 to vector<10x10x96xf32>
    %c0 = arith.constant 0 : index
    %c0_0 = arith.constant 0 : index
    %c0_1 = arith.constant 0 : index
    %1 = vector.load %arg8[%c0, %c0_0, %c0_1] : memref<10x10x96xf32, #tpu.memory_space<vmem>>, vector<10x10x96xf32>
    tpu.vector_store %arg8[%c0, %c0_0, %c0_1], %0 {strides = array<i32>} : memref<10x10x96xf32, #tpu.memory_space<vmem>>, vector<10x10x96xf32>,
    %c0_2 = arith.constant 0 : index
    %c0_3 = arith.constant 0 : index
    %c0_4 = arith.constant 0 : index
    %c0_5 = arith.constant 0 : index
    %2 = vector.load %arg1[%c0_2, %c0_3, %c0_4, %c0_5] : memref<1x8x8x32xf32, #tpu.memory_space<vmem>>, vector<1x8x8x32xf32>
    %3 = vector.shape_cast %2 : vector<1x8x8x32xf32> to vector<8x8x32xf32>
    %4 = tpu.concatenate %3, %3, %3 in 2 : vector<8x8x32xf32>, vector<8x8x32xf32>, vector<8x8x32xf32> -> vector<8x8x96xf32>
    %c1 = arith.constant 1 : index
    %c1_6 = arith.constant 1 : index
    %c0_7 = arith.constant 0 : index
    %5 = vector.load %arg8[%c1, %c1_6, %c0_7] : memref<10x10x96xf32, #tpu.memory_space<vmem>>, vector<8x8x96xf32>
    tpu.vector_store %arg8[%c1, %c1_6, %c0_7], %4 {strides = array<i32>} : memref<10x10x96xf32, #tpu.memory_space<vmem>>, vector<8x8x96xf32>,
    %c0_8 = arith.constant 0 : index
    %c0_9 = arith.constant 0 : index
    %6 = vector.load %arg2[%c0_8, %c0_9] : memref<9x96xf32, #tpu.memory_space<vmem>>, vector<9x96xf32>
    %cst_10 = arith.constant 0.000000e+00 : f32
    %7 = vector.broadcast %cst_10 : f32 to vector<8x8x96xf32>
    %c0_11 = arith.constant 0 : index
    %c0_12 = arith.constant 0 : index
    %c0_13 = arith.constant 0 : index
    %8 = vector.load %arg8[%c0_11, %c0_12, %c0_13] : memref<10x10x96xf32, #tpu.memory_space<vmem>>, vector<8x8x96xf32>
    %9 = vector.extract_strided_slice %6 {offsets = [0, 0], sizes = [1, 96], strides = [1, 1]} : vector<9x96xf32> to vector<1x96xf32>
    %10 = vector.shape_cast %9 : vector<1x96xf32> to vector<96xf32>
    %11 = vector.shape_cast %10 : vector<96xf32> to vector<1x1x96xf32>
    %12 = vector.broadcast %11 : vector<1x1x96xf32> to vector<8x8x96xf32>
    %13 = arith.mulf %8, %12 : vector<8x8x96xf32>
    %14 = arith.addf %7, %13 : vector<8x8x96xf32>
    %c0_14 = arith.constant 0 : index
    %c1_15 = arith.constant 1 : index
    %c0_16 = arith.constant 0 : index
    %15 = vector.load %arg8[%c0_14, %c1_15, %c0_16] : memref<10x10x96xf32, #tpu.memory_space<vmem>>, vector<8x8x96xf32>
    %16 = vector.extract_strided_slice %6 {offsets = [1, 0], sizes = [1, 96], strides = [1, 1]} : vector<9x96xf32> to vector<1x96xf32>
    %17 = vector.shape_cast %16 : vector<1x96xf32> to vector<96xf32>
    %18 = vector.shape_cast %17 : vector<96xf32> to vector<1x1x96xf32>
    %19 = vector.broadcast %18 : vector<1x1x96xf32> to vector<8x8x96xf32>
    %20 = arith.mulf %15, %19 : vector<8x8x96xf32>
    %21 = arith.addf %14, %20 : vector<8x8x96xf32>
    %c0_17 = arith.constant 0 : index
    %c2 = arith.constant 2 : index
    %c0_18 = arith.constant 0 : index
    %22 = vector.load %arg8[%c0_17, %c2, %c0_18] : memref<10x10x96xf32, #tpu.memory_space<vmem>>, vector<8x8x96xf32>
    %23 = vector.extract_strided_slice %6 {offsets = [2, 0], sizes = [1, 96], strides = [1, 1]} : vector<9x96xf32> to vector<1x96xf32>
    %24 = vector.shape_cast %23 : vector<1x96xf32> to vector<96xf32>
    %25 = vector.shape_cast %24 : vector<96xf32> to vector<1x1x96xf32>
    %26 = vector.broadcast %25 : vector<1x1x96xf32> to vector<8x8x96xf32>
    %27 = arith.mulf %22, %26 : vector<8x8x96xf32>
    %28 = arith.addf %21, %27 : vector<8x8x96xf32>
    %c1_19 = arith.constant 1 : index
    %c0_20 = arith.constant 0 : index
    %c0_21 = arith.constant 0 : index
    %29 = vector.load %arg8[%c1_19, %c0_20, %c0_21] : memref<10x10x96xf32, #tpu.memory_space<vmem>>, vector<8x8x96xf32>
    %30 = vector.extract_strided_slice %6 {offsets = [3, 0], sizes = [1, 96], strides = [1, 1]} : vector<9x96xf32> to vector<1x96xf32>
    %31 = vector.shape_cast %30 : vector<1x96xf32> to vector<96xf32>
    %32 = vector.shape_cast %31 : vector<96xf32> to vector<1x1x96xf32>
    %33 = vector.broadcast %32 : vector<1x1x96xf32> to vector<8x8x96xf32>
    %34 = arith.mulf %29, %33 : vector<8x8x96xf32>
    %35 = arith.addf %28, %34 : vector<8x8x96xf32>
    %c1_22 = arith.constant 1 : index
    %c1_23 = arith.constant 1 : index
    %c0_24 = arith.constant 0 : index
    %36 = vector.load %arg8[%c1_22, %c1_23, %c0_24] : memref<10x10x96xf32, #tpu.memory_space<vmem>>, vector<8x8x96xf32>
    %37 = vector.extract_strided_slice %6 {offsets = [4, 0], sizes = [1, 96], strides = [1, 1]} : vector<9x96xf32> to vector<1x96xf32>
    %38 = vector.shape_cast %37 : vector<1x96xf32> to vector<96xf32>
    %39 = vector.shape_cast %38 : vector<96xf32> to vector<1x1x96xf32>
    %40 = vector.broadcast %39 : vector<1x1x96xf32> to vector<8x8x96xf32>
    %41 = arith.mulf %36, %40 : vector<8x8x96xf32>
    %42 = arith.addf %35, %41 : vector<8x8x96xf32>
    %c1_25 = arith.constant 1 : index
    %c2_26 = arith.constant 2 : index
    %c0_27 = arith.constant 0 : index
    %43 = vector.load %arg8[%c1_25, %c2_26, %c0_27] : memref<10x10x96xf32, #tpu.memory_space<vmem>>, vector<8x8x96xf32>
    %44 = vector.extract_strided_slice %6 {offsets = [5, 0], sizes = [1, 96], strides = [1, 1]} : vector<9x96xf32> to vector<1x96xf32>
    %45 = vector.shape_cast %44 : vector<1x96xf32> to vector<96xf32>
    %46 = vector.shape_cast %45 : vector<96xf32> to vector<1x1x96xf32>
    %47 = vector.broadcast %46 : vector<1x1x96xf32> to vector<8x8x96xf32>
    %48 = arith.mulf %43, %47 : vector<8x8x96xf32>
    %49 = arith.addf %42, %48 : vector<8x8x96xf32>
    %c2_28 = arith.constant 2 : index
    %c0_29 = arith.constant 0 : index
    %c0_30 = arith.constant 0 : index
    %50 = vector.load %arg8[%c2_28, %c0_29, %c0_30] : memref<10x10x96xf32, #tpu.memory_space<vmem>>, vector<8x8x96xf32>
    %51 = vector.extract_strided_slice %6 {offsets = [6, 0], sizes = [1, 96], strides = [1, 1]} : vector<9x96xf32> to vector<1x96xf32>
    %52 = vector.shape_cast %51 : vector<1x96xf32> to vector<96xf32>
    %53 = vector.shape_cast %52 : vector<96xf32> to vector<1x1x96xf32>
    %54 = vector.broadcast %53 : vector<1x1x96xf32> to vector<8x8x96xf32>
    %55 = arith.mulf %50, %54 : vector<8x8x96xf32>
    %56 = arith.addf %49, %55 : vector<8x8x96xf32>
    %c2_31 = arith.constant 2 : index
    %c1_32 = arith.constant 1 : index
    %c0_33 = arith.constant 0 : index
    %57 = vector.load %arg8[%c2_31, %c1_32, %c0_33] : memref<10x10x96xf32, #tpu.memory_space<vmem>>, vector<8x8x96xf32>
    %58 = vector.extract_strided_slice %6 {offsets = [7, 0], sizes = [1, 96], strides = [1, 1]} : vector<9x96xf32> to vector<1x96xf32>
    %59 = vector.shape_cast %58 : vector<1x96xf32> to vector<96xf32>
    %60 = vector.shape_cast %59 : vector<96xf32> to vector<1x1x96xf32>
    %61 = vector.broadcast %60 : vector<1x1x96xf32> to vector<8x8x96xf32>
    %62 = arith.mulf %57, %61 : vector<8x8x96xf32>
    %63 = arith.addf %56, %62 : vector<8x8x96xf32>
    %c2_34 = arith.constant 2 : index
    %c2_35 = arith.constant 2 : index
    %c0_36 = arith.constant 0 : index
    %64 = vector.load %arg8[%c2_34, %c2_35, %c0_36] : memref<10x10x96xf32, #tpu.memory_space<vmem>>, vector<8x8x96xf32>
    %65 = vector.extract_strided_slice %6 {offsets = [8, 0], sizes = [1, 96], strides = [1, 1]} : vector<9x96xf32> to vector<1x96xf32>
    %66 = vector.shape_cast %65 : vector<1x96xf32> to vector<96xf32>
    %67 = vector.shape_cast %66 : vector<96xf32> to vector<1x1x96xf32>
    %68 = vector.broadcast %67 : vector<1x1x96xf32> to vector<8x8x96xf32>
    %69 = arith.mulf %64, %68 : vector<8x8x96xf32>
    %70 = arith.addf %63, %69 : vector<8x8x96xf32>
    %71 = vector.shape_cast %70 : vector<8x8x96xf32> to vector<64x96xf32>
    %c0_37 = arith.constant 0 : index
    %c0_38 = arith.constant 0 : index
    %72 = vector.load %arg3[%c0_37, %c0_38] : memref<96x48xf32, #tpu.memory_space<vmem>>, vector<96x48xf32>
    %cst_39 = arith.constant dense<0.000000e+00> : vector<64x48xf32>
    %73 = tpu.matmul %71, %72, %cst_39 {dimension_numbers = #tpu.dot_dimension_numbers<[1], [0], [0], [1], [0, 0, 1, 1], [], []>} : vector<64x96xf32>, vector<96x48xf32>, vector<64x48xf32> -> vector<64x48xf32>
    %c0_40 = arith.constant 0 : index
    %c0_41 = arith.constant 0 : index
    %74 = vector.load %arg4[%c0_40, %c0_41] : memref<1x48xf32, #tpu.memory_space<vmem>>, vector<1x48xf32>
    %75 = vector.broadcast %74 : vector<1x48xf32> to vector<64x48xf32>
    %76 = arith.addf %73, %75 : vector<64x48xf32>
    %cst_42 = arith.constant 0.000000e+00 : f32
    %77 = vector.broadcast %cst_42 : f32 to vector<64x32xf32>
    %78 = vector.extract_strided_slice %76 {offsets = [0, 0], sizes = [64, 8], strides = [1, 1]} : vector<64x48xf32> to vector<64x8xf32>
    %79 = vector.extract_strided_slice %76 {offsets = [0, 16], sizes = [64, 8], strides = [1, 1]} : vector<64x48xf32> to vector<64x8xf32>
    %80 = vector.extract_strided_slice %76 {offsets = [0, 32], sizes = [64, 8], strides = [1, 1]} : vector<64x48xf32> to vector<64x8xf32>
    %81 = tpu.transpose %79, [1, 0] : vector<64x8xf32> -> vector<8x64xf32>
    %cst_43 = arith.constant dense<0.000000e+00> : vector<64x64xf32>
    %82 = tpu.matmul %78, %81, %cst_43 {dimension_numbers = #tpu.dot_dimension_numbers<[1], [0], [0], [1], [0, 0, 1, 1], [], []>} : vector<64x8xf32>, vector<8x64xf32>, vector<64x64xf32> -> vector<64x64xf32>
    %cst_44 = arith.constant dense<0xFF800000> : vector<64xf32>
    %83 = vector.multi_reduction <maximumf>, %82, %cst_44 [1] : vector<64x64xf32> to vector<64xf32>
    %84 = vector.shape_cast %83 : vector<64xf32> to vector<64x1xf32>
    %85 = vector.broadcast %84 : vector<64x1xf32> to vector<64x64xf32>
    %86 = arith.subf %82, %85 : vector<64x64xf32>
    %87 = math.exp %86 : vector<64x64xf32>
    %cst_45 = arith.constant dense<0.000000e+00> : vector<64xf32>
    %88 = vector.multi_reduction <add>, %87, %cst_45 [1] : vector<64x64xf32> to vector<64xf32>
    %89 = vector.shape_cast %88 : vector<64xf32> to vector<64x1xf32>
    %90 = tpu.reciprocal %89 {approx = true} : vector<64x1xf32> -> vector<64x1xf32>
    %91 = vector.broadcast %90 : vector<64x1xf32> to vector<64x64xf32>
    %92 = arith.mulf %87, %91 : vector<64x64xf32>
    %cst_46 = arith.constant dense<0.000000e+00> : vector<64x8xf32>
    %93 = tpu.matmul %92, %80, %cst_46 {dimension_numbers = #tpu.dot_dimension_numbers<[1], [0], [0], [1], [0, 0, 1, 1], [], []>} : vector<64x64xf32>, vector<64x8xf32>, vector<64x8xf32> -> vector<64x8xf32>
    %c0_47 = arith.constant 0 : index
    %c0_48 = arith.constant 0 : index
    %c0_49 = arith.constant 0 : index
    %94 = vector.load %arg5[%c0_47, %c0_48, %c0_49] : memref<2x8x32xf32, #tpu.memory_space<vmem>>, vector<1x8x32xf32>
    %95 = vector.shape_cast %94 : vector<1x8x32xf32> to vector<8x32xf32>
    %cst_50 = arith.constant dense<0.000000e+00> : vector<64x32xf32>
    %96 = tpu.matmul %93, %95, %cst_50 {dimension_numbers = #tpu.dot_dimension_numbers<[1], [0], [0], [1], [0, 0, 1, 1], [], []>} : vector<64x8xf32>, vector<8x32xf32>, vector<64x32xf32> -> vector<64x32xf32>
    %97 = arith.addf %77, %96 : vector<64x32xf32>
    %98 = vector.extract_strided_slice %76 {offsets = [0, 8], sizes = [64, 8], strides = [1, 1]} : vector<64x48xf32> to vector<64x8xf32>
    %99 = vector.extract_strided_slice %76 {offsets = [0, 24], sizes = [64, 8], strides = [1, 1]} : vector<64x48xf32> to vector<64x8xf32>
    %100 = vector.extract_strided_slice %76 {offsets = [0, 40], sizes = [64, 8], strides = [1, 1]} : vector<64x48xf32> to vector<64x8xf32>
    %101 = tpu.transpose %99, [1, 0] : vector<64x8xf32> -> vector<8x64xf32>
    %cst_51 = arith.constant dense<0.000000e+00> : vector<64x64xf32>
    %102 = tpu.matmul %98, %101, %cst_51 {dimension_numbers = #tpu.dot_dimension_numbers<[1], [0], [0], [1], [0, 0, 1, 1], [], []>} : vector<64x8xf32>, vector<8x64xf32>, vector<64x64xf32> -> vector<64x64xf32>
    %cst_52 = arith.constant dense<0xFF800000> : vector<64xf32>
    %103 = vector.multi_reduction <maximumf>, %102, %cst_52 [1] : vector<64x64xf32> to vector<64xf32>
    %104 = vector.shape_cast %103 : vector<64xf32> to vector<64x1xf32>
    %105 = vector.broadcast %104 : vector<64x1xf32> to vector<64x64xf32>
    %106 = arith.subf %102, %105 : vector<64x64xf32>
    %107 = math.exp %106 : vector<64x64xf32>
    %cst_53 = arith.constant dense<0.000000e+00> : vector<64xf32>
    %108 = vector.multi_reduction <add>, %107, %cst_53 [1] : vector<64x64xf32> to vector<64xf32>
    %109 = vector.shape_cast %108 : vector<64xf32> to vector<64x1xf32>
    %110 = tpu.reciprocal %109 {approx = true} : vector<64x1xf32> -> vector<64x1xf32>
    %111 = vector.broadcast %110 : vector<64x1xf32> to vector<64x64xf32>
    %112 = arith.mulf %107, %111 : vector<64x64xf32>
    %cst_54 = arith.constant dense<0.000000e+00> : vector<64x8xf32>
    %113 = tpu.matmul %112, %100, %cst_54 {dimension_numbers = #tpu.dot_dimension_numbers<[1], [0], [0], [1], [0, 0, 1, 1], [], []>} : vector<64x64xf32>, vector<64x8xf32>, vector<64x8xf32> -> vector<64x8xf32>
    %c1_55 = arith.constant 1 : index
    %c0_56 = arith.constant 0 : index
    %c0_57 = arith.constant 0 : index
    %114 = vector.load %arg5[%c1_55, %c0_56, %c0_57] : memref<2x8x32xf32, #tpu.memory_space<vmem>>, vector<1x8x32xf32>
    %115 = vector.shape_cast %114 : vector<1x8x32xf32> to vector<8x32xf32>
    %cst_58 = arith.constant dense<0.000000e+00> : vector<64x32xf32>
    %116 = tpu.matmul %113, %115, %cst_58 {dimension_numbers = #tpu.dot_dimension_numbers<[1], [0], [0], [1], [0, 0, 1, 1], [], []>} : vector<64x8xf32>, vector<8x32xf32>, vector<64x32xf32> -> vector<64x32xf32>
    %117 = arith.addf %97, %116 : vector<64x32xf32>
    %c0_59 = arith.constant 0 : index
    %c0_60 = arith.constant 0 : index
    %118 = vector.load %arg6[%c0_59, %c0_60] : memref<1x32xf32, #tpu.memory_space<vmem>>, vector<1x32xf32>
    %119 = vector.broadcast %118 : vector<1x32xf32> to vector<64x32xf32>
    %120 = arith.addf %117, %119 : vector<64x32xf32>
    %c0_61 = arith.constant 0 : index
    %c0_62 = arith.constant 0 : index
    %c0_63 = arith.constant 0 : index
    %121 = vector.load %arg7[%c0_61, %c0_62, %c0_63] : memref<1x64x32xf32, #tpu.memory_space<vmem>>, vector<1x64x32xf32>
    %122 = vector.shape_cast %121 : vector<1x64x32xf32> to vector<64x32xf32>
    %123 = vector.shape_cast %120 : vector<64x32xf32> to vector<1x64x32xf32>
    tpu.vector_store %arg7[%c0_61, %c0_62, %c0_63], %123 {strides = array<i32>} : memref<1x64x32xf32, #tpu.memory_space<vmem>>, vector<1x64x32xf32>,
    return
  }
  func.func @transform_0(%arg0: i32) -> (i32, i32, i32, i32) {
    %c0_i32 = arith.constant 0 : i32
    %c0_i32_0 = arith.constant 0 : i32
    %c0_i32_1 = arith.constant 0 : i32
    %c0_i32_2 = arith.constant 0 : i32
    return %arg0, %c0_i32, %c0_i32_0, %c0_i32_1 : i32, i32, i32, i32
  }
  func.func @transform_1(%arg0: i32) -> (i32, i32) {
    %c0_i32 = arith.constant 0 : i32
    %c0_i32_0 = arith.constant 0 : i32
    %c0_i32_1 = arith.constant 0 : i32
    return %c0_i32, %c0_i32_0 : i32, i32
  }
  func.func @transform_2(%arg0: i32) -> (i32, i32) {
    %c0_i32 = arith.constant 0 : i32
    %c0_i32_0 = arith.constant 0 : i32
    %c0_i32_1 = arith.constant 0 : i32
    return %c0_i32, %c0_i32_0 : i32, i32
  }
  func.func @transform_3(%arg0: i32) -> (i32, i32) {
    %c0_i32 = arith.constant 0 : i32
    %c0_i32_0 = arith.constant 0 : i32
    %c0_i32_1 = arith.constant 0 : i32
    return %c0_i32, %c0_i32_0 : i32, i32
  }
  func.func @transform_4(%arg0: i32) -> (i32, i32, i32) {
    %c0_i32 = arith.constant 0 : i32
    %c0_i32_0 = arith.constant 0 : i32
    %c0_i32_1 = arith.constant 0 : i32
    %c0_i32_2 = arith.constant 0 : i32
    return %c0_i32, %c0_i32_0, %c0_i32_1 : i32, i32, i32
  }
  func.func @transform_5(%arg0: i32) -> (i32, i32) {
    %c0_i32 = arith.constant 0 : i32
    %c0_i32_0 = arith.constant 0 : i32
    %c0_i32_1 = arith.constant 0 : i32
    return %c0_i32, %c0_i32_0 : i32, i32
  }
  func.func @transform_6(%arg0: i32) -> (i32, i32, i32) {
    %c0_i32 = arith.constant 0 : i32
    %c0_i32_0 = arith.constant 0 : i32
    %c0_i32_1 = arith.constant 0 : i32
    return %arg0, %c0_i32, %c0_i32_0 : i32, i32, i32
  }
}

</mosaic_0001>

<bundles_post_ra>
// kernel: tpu_custom_call.1
= control target key start
LH: loop header
LB: loop body
LE: loop exit
PB: predicated region body
PF: predicated region fallthrough
CT: control target
= control target key end

     0   :  { %11 = vsyncpa [#allocation4], 0  ;;  %s2494_s21 = smov 0   ;;  %s3110_s0 = inlined_call_operand.vmem [shape: f32[2,8,8,32], index: 0, kind: input, shape index: {}]   ;;  %s3111_s1 = inlined_call_operand.vmem [shape: f32[9,96], index: 1, kind: input, shape index: {}]   ;;  %s3112_s2 = inlined_call_operand.vmem [shape: f32[96,48], index: 2, kind: input, shape index: {}]   ;;  %s3113_s3 = inlined_call_operand.vmem [shape: f32[1,48], index: 3, kind: input, shape index: {}]   ;;  %s3114_s4 = inlined_call_operand.hbm [shape: f32[2,8,32], index: 4, kind: input, shape index: {}]   ;;  %s3115_s5 = inlined_call_operand.vmem [shape: f32[1,32], index: 5, kind: input, shape index: {}]   ;;  %s3116_s6 = inlined_call_operand.vmem [shape: f32[2,64,32], index: 6, kind: output, shape index: {}]  }
   0x1 LB: > { %s1947_s22 = sadd.s32 4294967295, %s2446_s21   ;;  %p1949_p0 = scmp.ge.s32.totalorder %s2446_s21, 1  ;;  %s2446_s21 = sphi %s2494_s21, %s17_s21  }
   0x2   : > { %p179_p1 = scmp.lt.s32.totalorder %s2446_s21, 3  ;;  %s2448_s23 = smov [#allocation3]  }
   0x3   : > { %s200_s24 = sshll.u32 %s2448_s23, 4  ;;  %p2325_p3 = scmp.eq.s32.totalorder %s1947_s22, 0  ;;  %s201_s24 = int_to_ptr.vmem [resolvable:$true] %s200_s24 }
   0x4   : > { %p2502_p2 = pnand %p1949_p0, %p179_p1  ;;  %s2421_s26 = scalar_lea.vmem %s201_s24, 256 }
   0x5   : > { %p2422_p7 = scmp.ne.s32.totalorder %s201_s24, %s2421_s26  ;;  %p2429_p10 = scmp.lt.s32.totalorder %s201_s24, %s201_s24 }
   0x6   : > { %p2321_p4 = pneg %p2502_p2  ;;  %p2430_p11 = scmp.lt.s32.totalorder %s2421_s26, %s2421_s26 }
   0x8   : > { %p2322_p5 = pnand %p2325_p3, %p2321_p4  ;;  %p2431_p12 = por %p2430_p11, %p2429_p10 }
   0xa   : > { %p2412_p6 = pneg %p2322_p5 }
   0xc   : > { %p2424_p8 = pnand %p2422_p7, %p2412_p6 }
   0xe   : > { %p2425_p9 = pneg %p2424_p8 }
  0x10   : > { %p2432_p13 = pnand %p2431_p12, %p2425_p9 }
  0x12   : > { %2435 = shalt.err (!%p2432_p13)
}
  0x13   : > { %s2449_s27 = smov 128   ;;  %s2450_s28 = smov 8  }
  0x14   : > { %2324 = dma.hbm_to_vmem [thread:$0]  (!%p2322_p5), %s3114_s4, 256, %s201_s24, [#allocation4], %s2449_s27, %s2449_s27, %s2450_s28  }
  0x15   : > { %227 = sbr.rel (%p2502_p2) target bundleno = 1555 (0x613), region = 44 }
  0x1a   : > { %2441 = dma.done.wait (%p2325_p3), [#allocation4], 256  }
  0x1b   : > { %2443 = vsyncadd (%p2325_p3), [#allocation4], 4294967040  ;;  %p257_p0 = scmp.lt.s32.totalorder %s1947_s22, 1  ;;  %vm267_vm0 = vcmask 785408   ;;  %vm269_vm1 = vcmask 779264   ;;  %v2451_v0 = vmov 0.0   ;;  %v390_v21 = vlaneseq }
  0x1c   : > { %271 = vst.msk [vmem:[#allocation2 + $0x10] sm:$0xff] %vm267_vm0, %v2451_v0  ;;  %268 = vst.msk [vmem:[#allocation2] sm:$0xff] %vm267_vm0, %v2451_v0  ;;  %s2452_s11 = smov 32   ;;  %v646_v4 = vld [vmem:[%s3112_s2 + $0x58] sm:$0xff]  ;;  %v645_v5 = vld [vmem:[%s3112_s2 + $0x50] sm:$0xff]  ;;  %s2453_s16 = smov 64  }
  0x1d   : > { %s3119_s22 = smov (!%p257_p0, %s1947_s22), 1  ;;  %272 = vst.msk [vmem:[#allocation2 + $0x18] sm:$0x3] %vm269_vm1, %v2451_v0  ;;  %270 = vst.msk [vmem:[#allocation2 + $0x8] sm:$0x3] %vm269_vm1, %v2451_v0  ;;  %2139 = vmatprep.subr.mxu0 %v646_v4  ;;  %v644_v6 = vld [vmem:[%s3112_s2 + $0x48] sm:$0xff] }
  0x1e   : > { %273 = vst.msk [vmem:[#allocation2 + $0x20] sm:$0xff] %vm267_vm0, %v2451_v0  ;;  %275 = vst.msk [vmem:[#allocation2 + $0x30] sm:$0xff] %vm267_vm0, %v2451_v0  ;;  %s2035_s7 = sshll.u32 %s3119_s22, 6  ;;  %2140 = vmatpush3.msra.mxu0 %v646_v4  ;;  %v643_v7 = vld [vmem:[%s3112_s2 + $0x40] sm:$0xff]  ;;  %v642_v10 = vld [vmem:[%s3112_s2 + $0x38] sm:$0xff]  ;;  %v391_v22 = vshrl.u32 %v390_v21, 7 }
  0x1f   : > { %274 = vst.msk [vmem:[#allocation2 + $0x28] sm:$0x3] %vm269_vm1, %v2451_v0  ;;  %276 = vst.msk [vmem:[#allocation2 + $0x38] sm:$0x3] %vm269_vm1, %v2451_v0  ;;  %s2544_s10 = scalar_lea.vmem %s3110_s0, %s2035_s7  ;;  %2141 = vmatprep.subr.mxu0 %v645_v5  ;;  %v641_v11 = vld [vmem:[%s3112_s2 + $0x30] sm:$0xff]  ;;  %v640_v12 = vld [vmem:[%s3112_s2 + $0x28] sm:$0xff]  ;;  %s3089_s12 = scalar_lea.vmem %s3116_s6, %s2035_s7 }
  0x20   : > { %277 = vst.msk [vmem:[#allocation2 + $0x40] sm:$0xff] %vm267_vm0, %v2451_v0  ;;  %279 = vst.msk [vmem:[#allocation2 + $0x50] sm:$0xff] %vm267_vm0, %v2451_v0  ;;  %v2547_v1 = vld [vmem:[%s2544_s10 + $0x8] sm:$0xff]  ;;  %v2550_v2 = vld [vmem:[%s2544_s10] sm:$0xff]  ;;  %2142 = vmatpush3.msra.mxu0 %v645_v5  ;;  %v392_v23 = vsub.s32 0, %v391_v22  ;;  %v420_v24 = vsub.s32 1, %v391_v22 }
  0x21   : > { %278 = vst.msk [vmem:[#allocation2 + $0x48] sm:$0x3] %vm269_vm1, %v2451_v0  ;;  %280 = vst.msk [vmem:[#allocation2 + $0x58] sm:$0x3] %vm269_vm1, %v2451_v0  ;;  %307 = vrot.lane.b32.xlu1 %v2547_v1, %s2452_s11  ;;  %305 = vrot.lane.b32.xlu0 %v2550_v2, %s2452_s11  ;;  %v2557_v3 = vld [vmem:[%s2544_s10 + $0x10] sm:$0xff]  ;;  %v2580_v8 = vld [vmem:[%s2544_s10 + $0x20] sm:$0xff] }
  0x22   : > { %281 = vst.msk [vmem:[#allocation2 + $0x60] sm:$0xff] %vm267_vm0, %v2451_v0  ;;  %283 = vst.msk [vmem:[#allocation2 + $0x70] sm:$0xff] %vm267_vm0, %v2451_v0  ;;  %v2583_v9 = vld [vmem:[%s2544_s10 + $0x18] sm:$0xff]  ;;  %2143 = vmatprep.subr.mxu0 %v644_v6  ;;  %v2603_v13 = vld [vmem:[%s2544_s10 + $0x30] sm:$0xff]  ;;  %v448_v30 = vsub.s32 2, %v391_v22  ;;  %vm353_vm2 = vcmask 261120  }
  0x23   : > { %282 = vst.msk [vmem:[#allocation2 + $0x68] sm:$0x3] %vm269_vm1, %v2451_v0  ;;  %284 = vst.msk [vmem:[#allocation2 + $0x78] sm:$0x3] %vm269_vm1, %v2451_v0  ;;  %2144 = vmatpush3.msra.mxu0 %v644_v6  ;;  %v2606_v14 = vld [vmem:[%s2544_s10 + $0x28] sm:$0xff]  ;;  %v639_v15 = vld [vmem:[%s3112_s2 + $0x20] sm:$0xff] }
  0x24   : > { %285 = vst.msk [vmem:[#allocation2 + $0x80] sm:$0xff] %vm267_vm0, %v2451_v0  ;;  %287 = vst.msk [vmem:[#allocation2 + $0x90] sm:$0xff] %vm267_vm0, %v2451_v0  ;;  %2145 = vmatprep.subr.mxu0 %v643_v7  ;;  %v638_v16 = vld [vmem:[%s3112_s2 + $0x18] sm:$0xff]  ;;  %v637_v17 = vld [vmem:[%s3112_s2 + $0x10] sm:$0xff]  ;;  %vm362_vm3 = vcmask 523264   ;;  %v476_v41 = vsub.s32 3, %v391_v22 }
  0x25   : > { %286 = vst.msk [vmem:[#allocation2 + $0x88] sm:$0x3] %vm269_vm1, %v2451_v0  ;;  %288 = vst.msk [vmem:[#allocation2 + $0x98] sm:$0x3] %vm269_vm1, %v2451_v0  ;;  %309 = vrot.lane.b32.xlu1 %v2557_v3, %s2452_s11  ;;  %329 = vrot.lane.b32.xlu0 %v2550_v2, %s2453_s16  ;;  %v2626_v18 = vld [vmem:[%s2544_s10 + $0x38] sm:$0xff]  ;;  %v636_v19 = vld [vmem:[%s3112_s2 + $0x8] sm:$0xff] }
  0x26   : > { %2146 = vmatpush3.msra.mxu0 %v643_v7  ;;  %v635_v20 = vld [vmem:[%s3112_s2] sm:$0xff]  ;;  %v504_v42 = vsub.s32 4, %v391_v22  ;;  %v532_v52 = vsub.s32 5, %v391_v22  ;;  %v561_v53 = vsub.s32 6, %v391_v22  ;;  %v589_v54 = vsub.s32 7, %v391_v22  ;;  %s2454_s24 = smov 112  }
  0x27   : > { %2147 = vmatprep.subr.mxu0 %v642_v10  ;;  %v380_v25 = vld [vmem:[%s3111_s1] sm:$0xff]  ;;  %v2689_v21 = vld [vmem:[%s3111_s1 + $0x8] ss:$0 sm:$0xff]  ;;  %vm807_vm4 = vcmask 64512   ;;  %s2455_s25 = smov 104   ;;  %s2456_s26 = smov 120  }
  0x28   : > { %2148 = vmatpush3.msra.mxu0 %v642_v10  ;;  %v2641_v28 = vrot.slane %v380_v25, %v392_v23  ;;  %v2643_v29 = vrot.slane %v380_v25, %v420_v24  ;;  %v382_v31 = vld [vmem:[#allocation2] sm:$0xff]  ;;  %v2649_v38 = vrot.slane %v380_v25, %v448_v30  ;;  %v2662_v51 = vrot.slane %v380_v25, %v476_v41  ;;  %s2457_s27 = smov 96   ;;  %s2458_s28 = smov 88  }
  0x29   : > { %333 = vrot.lane.b32.xlu1 %v2557_v3, %s2453_s16  ;;  %331 = vrot.lane.b32.xlu0 %v2547_v1, %s2453_s16  ;;  %v410_v32 = vld [vmem:[#allocation2 + $0x1] sm:$0xff]  ;;  %v2664_v58 = vrot.slane %v380_v25, %v504_v42  ;;  %v2667_v63 = vrot.slane %v380_v25, %v532_v52 }
  0x2a   : > { %2149 = vmatprep.subr.mxu0 %v641_v11  ;;  %v394_v36 = vmul.f32 %v2641_v28, %v382_v31  ;;  %v422_v37 = vmul.f32 %v2643_v29, %v410_v32  ;;  %v438_v40 = vld [vmem:[#allocation2 + $0x2] sm:$0xff] }
  0x2b   : > { %2150 = vmatpush3.msra.mxu0 %v641_v11  ;;  %v450_v48 = vmul.f32 %v2649_v38, %v438_v40 }
  0x2c   : > { %2151 = vmatprep.subr.mxu0 %v640_v12  ;;  %v430_v47 = vadd.f32 %v422_v37, %v394_v36 }
  0x2d   : > { %313 = vrot.lane.b32.xlu1 %v2580_v8, %s2452_s11  ;;  %311 = vrot.lane.b32.xlu0 %v2583_v9, %s2452_s11 }
  0x2e   : > { %2152 = vmatpush3.msra.mxu0 %v640_v12  ;;  %v458_v57 = vadd.f32 %v450_v48, %v430_v47 }
  0x2f   : > { %2153 = vmatprep.subr.mxu0 %v639_v15 }
  0x30   : > { %2154 = vmatpush3.msra.mxu0 %v639_v15 }
  0x31   : > { %337 = vrot.lane.b32.xlu1 %v2580_v8, %s2453_s16  ;;  %335 = vrot.lane.b32.xlu0 %v2583_v9, %s2453_s16 }
  0x32   : > { %2155 = vmatprep.subr.mxu0 %v638_v16 }
  0x33   : > { %2156 = vmatpush3.msra.mxu0 %v638_v16 }
  0x34   : > { %2157 = vmatprep.subr.mxu0 %v637_v17 }
  0x35   : > { %317 = vrot.lane.b32.xlu1 %v2603_v13, %s2452_s11  ;;  %315 = vrot.lane.b32.xlu0 %v2606_v14, %s2452_s11 }
  0x36   : > { %2158 = vmatpush3.msra.mxu0 %v637_v17 }
  0x37   : > { %2159 = vmatprep.subr.mxu0 %v636_v19 }
  0x38   : > { %2160 = vmatpush3.msra.mxu0 %v636_v19 }
  0x39   : > { %341 = vrot.lane.b32.xlu1 %v2603_v13, %s2453_s16  ;;  %339 = vrot.lane.b32.xlu0 %v2606_v14, %s2453_s16 }
  0x3a   : > { %2161 = vmatprep.subr.mxu0 %v635_v20 }
  0x3b   : > { %2162 = vmatpush3.msra.mxu0 %v635_v20 }
  0x3d   : > { %319 = vrot.lane.b32.xlu0 %v2626_v18, %s2452_s11  ;;  %343 = vrot.lane.b32.xlu1 %v2626_v18, %s2453_s16 }
  0x93   : > { %v308_v26 = vpop.permute.xlu1 %307  ;;  %v306_v27 = vpop.permute.xlu0 %305 }
  0x94   : > { %v354_v33 = vsel %vm353_vm2, %v2550_v2, %v306_v27  ;;  %v355_v43 = vsel %vm353_vm2, %v2547_v1, %v308_v26  ;;  %v2670_v1 = vrot.slane %v380_v25, %v561_v53  ;;  %v2672_v2 = vrot.slane %v380_v25, %v589_v54 }
  0x97   : > { %v310_v34 = vpop.permute.xlu1 %309  ;;  %v330_v35 = vpop.permute.xlu0 %329 }
  0x98   : > { %v363_v39 = vsel %vm362_vm3, %v354_v33, %v330_v35  ;;  %v356_v44 = vsel %vm353_vm2, %v2557_v3, %v310_v34 }
  0x99   : > { %372 = vst.msk [vmem:[#allocation2 + $0x11] sm:$0xff] %vm267_vm0, %v363_v39 }
  0x9b   : > { %v334_v45 = vpop.permute.xlu1 %333  ;;  %v332_v46 = vpop.permute.xlu0 %331 }
  0x9c   : > { %v365_v49 = vsel %vm362_vm3, %v356_v44, %v334_v45  ;;  %v364_v50 = vsel %vm362_vm3, %v355_v43, %v332_v46 }
  0x9d   : > { %374 = vst.msk [vmem:[#allocation2 + $0x31] sm:$0xff] %vm267_vm0, %v365_v49  ;;  %373 = vst.msk [vmem:[#allocation2 + $0x21] sm:$0xff] %vm267_vm0, %v364_v50 }
  0x9f   : > { %v314_v55 = vpop.permute.xlu1 %313  ;;  %v312_v56 = vpop.permute.xlu0 %311 }
  0xa0   : > { %v466_v59 = vld [vmem:[#allocation2 + $0x10] sm:$0xff]  ;;  %v358_v4 = vsel %vm353_vm2, %v2580_v8, %v314_v55  ;;  %v357_v5 = vsel %vm353_vm2, %v2583_v9, %v312_v56 }
  0xa1   : > { %v494_v60 = vld [vmem:[#allocation2 + $0x11] sm:$0xff]  ;;  %v478_v61 = vmul.f32 %v2662_v51, %v466_v59  ;;  %v395_v0 = vmul.f32 %v466_v59, %v2641_v28 }
  0xa2   : > { %v522_v62 = vld [vmem:[#allocation2 + $0x12] sm:$0xff]  ;;  %v423_v3 = vmul.f32 %v494_v60, %v2643_v29  ;;  %v506_v11 = vmul.f32 %v2664_v58, %v494_v60 }
  0xa3   : > { %v338_v6 = vpop.permute.xlu1 %337  ;;  %v336_v7 = vpop.permute.xlu0 %335  ;;  %v486_v10 = vadd.f32 %v478_v61, %v458_v57  ;;  %v451_v19 = vmul.f32 %v522_v62, %v2649_v38  ;;  %v534_v9 = vmul.f32 %v2667_v63, %v522_v62 }
  0xa4   : > { %v367_v12 = vsel %vm362_vm3, %v358_v4, %v338_v6  ;;  %v366_v15 = vsel %vm362_vm3, %v357_v5, %v336_v7  ;;  %v551_v16 = vld [vmem:[#allocation2 + $0x20] sm:$0xff]  ;;  %v431_v17 = vadd.f32 %v423_v3, %v395_v0  ;;  %v552_v31 = vld [vmem:[#allocation2 + $0x30] sm:$0xff] }
  0xa5   : > { %376 = vst.msk [vmem:[#allocation2 + $0x51] sm:$0xff] %vm267_vm0, %v367_v12  ;;  %375 = vst.msk [vmem:[#allocation2 + $0x41] sm:$0xff] %vm267_vm0, %v366_v15  ;;  %v514_v8 = vadd.f32 %v506_v11, %v486_v10  ;;  %v579_v20 = vld [vmem:[#allocation2 + $0x21] sm:$0xff]  ;;  %v479_v24 = vmul.f32 %v551_v16, %v2662_v51  ;;  %v563_v30 = vmul.f32 %v2670_v1, %v551_v16  ;;  %v580_v35 = vld [vmem:[#allocation2 + $0x31] sm:$0xff] }
  0xa6   : > { %v607_v22 = vld [vmem:[#allocation2 + $0x22] sm:$0xff]  ;;  %v459_v23 = vadd.f32 %v451_v19, %v431_v17  ;;  %v591_v32 = vmul.f32 %v2672_v2, %v579_v20  ;;  %v507_v34 = vmul.f32 %v579_v20, %v2664_v58  ;;  %v396_v36 = vmul.f32 %v551_v16, %v2641_v28  ;;  %v608_v49 = vld [vmem:[#allocation2 + $0x32] sm:$0xff] }
  0xa7   : > { %v318_v25 = vpop.permute.xlu1 %317  ;;  %v316_v26 = vpop.permute.xlu0 %315  ;;  %v542_v27 = vadd.f32 %v534_v9, %v514_v8  ;;  %v619_v39 = vmul.f32 %v2689_v21, %v607_v22  ;;  %v535_v40 = vmul.f32 %v607_v22, %v2667_v63  ;;  %v424_v41 = vmul.f32 %v579_v20, %v2643_v29 }
  0xa8   : > { %v487_v33 = vadd.f32 %v479_v24, %v459_v23  ;;  %v360_v42 = vsel %vm353_vm2, %v2603_v13, %v318_v25  ;;  %v359_v43 = vsel %vm353_vm2, %v2606_v14, %v316_v26  ;;  %v397_v45 = vmul.f32 %v552_v31, %v2641_v28 }
  0xa9   : > { %v571_v37 = vadd.f32 %v563_v30, %v542_v27  ;;  %v432_v50 = vadd.f32 %v424_v41, %v396_v36  ;;  %v452_v52 = vmul.f32 %v607_v22, %v2649_v38  ;;  %v425_v53 = vmul.f32 %v580_v35, %v2643_v29 }
  0xaa   : > { %v515_v44 = vadd.f32 %v507_v34, %v487_v33  ;;  %v564_v56 = vmul.f32 %v2670_v1, %v552_v31  ;;  %v592_v59 = vmul.f32 %v2672_v2, %v580_v35  ;;  %v480_v61 = vmul.f32 %v552_v31, %v2662_v51 }
  0xab   : > { %v342_v46 = vpop.permute.xlu1 %341  ;;  %v340_v47 = vpop.permute.xlu0 %339  ;;  %v599_v48 = vadd.f32 %v591_v32, %v571_v37  ;;  %v460_v60 = vadd.f32 %v452_v52, %v432_v50  ;;  %v433_v0 = vadd.f32 %v425_v53, %v397_v45  ;;  %v453_v3 = vmul.f32 %v608_v49, %v2649_v38 }
  0xac   : > { %v369_v54 = vsel %vm362_vm3, %v360_v42, %v342_v46  ;;  %v368_v55 = vsel %vm362_vm3, %v359_v43, %v340_v47  ;;  %v543_v13 = vadd.f32 %v535_v40, %v515_v44  ;;  %v553_v14 = vld [vmem:[#allocation2 + $0x40] sm:$0xff]  ;;  %v620_v7 = vmul.f32 %v2689_v21, %v608_v49  ;;  %v554_v23 = vld [vmem:[#allocation2 + $0x50] sm:$0xff] }
  0xad   : > { %378 = vst.msk [vmem:[#allocation2 + $0x71] sm:$0xff] %vm267_vm0, %v369_v54  ;;  %377 = vst.msk [vmem:[#allocation2 + $0x61] sm:$0xff] %vm267_vm0, %v368_v55  ;;  %v627_v57 = vadd.f32 %v619_v39, %v599_v48  ;;  %v481_v4 = vmul.f32 %v553_v14, %v2662_v51  ;;  %v488_v10 = vadd.f32 %v480_v61, %v460_v60  ;;  %v581_v12 = vld [vmem:[#allocation2 + $0x41] sm:$0xff]  ;;  %v582_v24 = vld [vmem:[#allocation2 + $0x51] sm:$0xff] }
  0xae   : > { %v572_v62 = vadd.f32 %v564_v56, %v543_v13  ;;  %v508_v11 = vmul.f32 %v580_v35, %v2664_v58  ;;  %v536_v17 = vmul.f32 %v608_v49, %v2667_v63  ;;  %v609_v19 = vld [vmem:[#allocation2 + $0x42] sm:$0xff]  ;;  %v461_v8 = vadd.f32 %v453_v3, %v433_v0  ;;  %v610_v34 = vld [vmem:[#allocation2 + $0x52] sm:$0xff] }
  0xaf   : > { %v320_v5 = vpop.permute.xlu0 %319  ;;  %2163 = vmatprep.mubr.msk.f32.mxu0 %vm267_vm0, %v627_v57  ;;  %v344_v6 = vpop.permute.xlu1 %343  ;;  %v565_v22 = vmul.f32 %v2670_v1, %v553_v14  ;;  %v398_v25 = vmul.f32 %v553_v14, %v2641_v28  ;;  %v426_v30 = vmul.f32 %v581_v12, %v2643_v29  ;;  %v593_v32 = vmul.f32 %v2672_v2, %v581_v12 }
  0xb0   : > { %v361_v15 = vsel %vm353_vm2, %v2626_v18, %v320_v5  ;;  %v600_v16 = vadd.f32 %v592_v59, %v572_v62  ;;  %v516_v20 = vadd.f32 %v508_v11, %v488_v10  ;;  %v489_v27 = vadd.f32 %v481_v4, %v461_v8 }
  0xb1   : > { %v370_v9 = vsel %vm362_vm3, %v361_v15, %v344_v6  ;;  %v509_v18 = vmul.f32 %v581_v12, %v2664_v58  ;;  %v537_v33 = vmul.f32 %v609_v19, %v2667_v63  ;;  %v454_v35 = vmul.f32 %v609_v19, %v2649_v38 }
  0xb2   : > { %379 = vst.msk [vmem:[#allocation2 + $0x81] sm:$0xff] %vm267_vm0, %v370_v9  ;;  %v628_v26 = vadd.f32 %v620_v7, %v600_v16  ;;  %v544_v31 = vadd.f32 %v536_v17, %v516_v20  ;;  %v434_v37 = vadd.f32 %v426_v30, %v398_v25  ;;  %v399_v40 = vmul.f32 %v554_v23, %v2641_v28 }
  0xb3   : > { %v517_v36 = vadd.f32 %v509_v18, %v489_v27  ;;  %v427_v41 = vmul.f32 %v582_v24, %v2643_v29  ;;  %v621_v43 = vmul.f32 %v2689_v21, %v609_v19  ;;  %v566_v44 = vmul.f32 %v2670_v1, %v554_v23 }
  0xb4   : > { %2164 = vmatmul.mubr.msk.f32.vlgmr.msra.gmra.mxu0 %vm267_vm0, %v628_v26  ;;  %v555_v39 = vld [vmem:[#allocation2 + $0x60] sm:$0xff]  ;;  %v573_v42 = vadd.f32 %v565_v22, %v544_v31  ;;  %v482_v45 = vmul.f32 %v554_v23, %v2662_v51  ;;  %v462_v47 = vadd.f32 %v454_v35, %v434_v37  ;;  %v455_v50 = vmul.f32 %v610_v34, %v2649_v38  ;;  %v556_v6 = vld [vmem:[#allocation2 + $0x70] sm:$0xff] }
  0xb5   : > { %v545_v46 = vadd.f32 %v537_v33, %v517_v36  ;;  %v583_v48 = vld [vmem:[#allocation2 + $0x61] sm:$0xff]  ;;  %v435_v49 = vadd.f32 %v427_v41, %v399_v40  ;;  %v594_v53 = vmul.f32 %v2672_v2, %v582_v24  ;;  %v622_v54 = vmul.f32 %v2689_v21, %v610_v34  ;;  %v584_v15 = vld [vmem:[#allocation2 + $0x71] sm:$0xff] }
  0xb6   : > { %v601_v52 = vadd.f32 %v593_v32, %v573_v42  ;;  %v483_v55 = vmul.f32 %v555_v39, %v2662_v51  ;;  %v490_v56 = vadd.f32 %v482_v45, %v462_v47  ;;  %v510_v14 = vmul.f32 %v582_v24, %v2664_v58  ;;  %v611_v57 = vld [vmem:[#allocation2 + $0x62] sm:$0xff]  ;;  %v612_v9 = vld [vmem:[#allocation2 + $0x72] sm:$0xff] }
  0xb7   : > { %v574_v13 = vadd.f32 %v566_v44, %v545_v46  ;;  %v463_v59 = vadd.f32 %v455_v50, %v435_v49  ;;  %v538_v61 = vmul.f32 %v610_v34, %v2667_v63  ;;  %v511_v62 = vmul.f32 %v583_v48, %v2664_v58  ;;  %v558_v46 = vld [vmem:[#allocation2 + $0x90] sm:$0xff] }
  0xb8   : > { %v629_v60 = vadd.f32 %v621_v43, %v601_v52  ;;  %v400_v0 = vmul.f32 %v555_v39, %v2641_v28  ;;  %v518_v4 = vadd.f32 %v510_v14, %v490_v56  ;;  %v428_v7 = vmul.f32 %v583_v48, %v2643_v29  ;;  %v614_v14 = vld [vmem:[#allocation2 + $0x92] sm:$0xff] }
  0xb9   : > { %v602_v3 = vadd.f32 %v594_v53, %v574_v13  ;;  %v491_v5 = vadd.f32 %v483_v55, %v463_v59  ;;  %v567_v10 = vmul.f32 %v2670_v1, %v555_v39  ;;  %v595_v11 = vmul.f32 %v2672_v2, %v583_v48  ;;  %v557_v22 = vld [vmem:[#allocation2 + $0x80] sm:$0xff]  ;;  %v586_v53 = vld [vmem:[#allocation2 + $0x91] sm:$0xff] }
  0xba   : > { %2166 = vmatprep.mubr.msk.f32.mxu0 %vm267_vm0, %v629_v60  ;;  %v539_v12 = vmul.f32 %v611_v57, %v2667_v63  ;;  %v456_v16 = vmul.f32 %v611_v57, %v2649_v38  ;;  %v546_v19 = vadd.f32 %v538_v61, %v518_v4  ;;  %v436_v20 = vadd.f32 %v428_v7, %v400_v0  ;;  %v585_v42 = vld [vmem:[#allocation2 + $0x81] sm:$0xff] }
  0xbb   : > { %v630_v17 = vadd.f32 %v622_v54, %v602_v3  ;;  %v519_v8 = vadd.f32 %v511_v62, %v491_v5  ;;  %v623_v23 = vmul.f32 %v2689_v21, %v611_v57  ;;  %v568_v24 = vmul.f32 %v2670_v1, %v556_v6  ;;  %v613_v48 = vld [vmem:[#allocation2 + $0x82] sm:$0xff] }
  0xbc   : > { %v484_v25 = vmul.f32 %v556_v6, %v2662_v51  ;;  %v401_v26 = vmul.f32 %v556_v6, %v2641_v28  ;;  %v575_v27 = vadd.f32 %v567_v10, %v546_v19  ;;  %v464_v30 = vadd.f32 %v456_v16, %v436_v20 }
  0xbd   : > { %2167 = vmatmul.mubr.msk.f32.gmra.mxu0 %vm267_vm0, %v630_v17  ;;  %v547_v18 = vadd.f32 %v539_v12, %v519_v8  ;;  %v429_v31 = vmul.f32 %v584_v15, %v2643_v29  ;;  %v596_v32 = vmul.f32 %v2672_v2, %v584_v15  ;;  %v512_v33 = vmul.f32 %v584_v15, %v2664_v58 }
  0xbe   : > { %v457_v34 = vmul.f32 %v612_v9, %v2649_v38  ;;  %v485_v35 = vmul.f32 %v557_v22, %v2662_v51  ;;  %v603_v36 = vadd.f32 %v595_v11, %v575_v27  ;;  %v492_v39 = vadd.f32 %v484_v25, %v464_v30 }
  0xbf   : > { %v576_v37 = vadd.f32 %v568_v24, %v547_v18  ;;  %v437_v40 = vadd.f32 %v429_v31, %v401_v26  ;;  %v624_v28 = vmul.f32 %v2689_v21, %v612_v9  ;;  %v540_v41 = vmul.f32 %v612_v9, %v2667_v63 }
  0xc0   : > { %v631_v43 = vadd.f32 %v623_v23, %v603_v36  ;;  %v520_v29 = vadd.f32 %v512_v33, %v492_v39  ;;  %v569_v47 = vmul.f32 %v2670_v1, %v557_v22  ;;  %v513_v50 = vmul.f32 %v585_v42, %v2664_v58 }
  0xc1   : > { %v604_v44 = vadd.f32 %v596_v32, %v576_v37  ;;  %v465_v45 = vadd.f32 %v457_v34, %v437_v40  ;;  %v570_v52 = vmul.f32 %v2670_v1, %v558_v46  ;;  %v597_v55 = vmul.f32 %v2672_v2, %v585_v42 }
  0xc2   : > { %2169 = vmatprep.mubr.msk.f32.mxu0 %vm267_vm0, %v631_v43  ;;  %v548_v51 = vadd.f32 %v540_v41, %v520_v29  ;;  %v541_v56 = vmul.f32 %v613_v48, %v2667_v63  ;;  %v625_v59 = vmul.f32 %v2689_v21, %v613_v48  ;;  %v598_v61 = vmul.f32 %v2672_v2, %v586_v53  ;;  %v1959_v63 = vld [vmem:[%s3113_s3] ss:$0 sm:$0xff] }
  0xc3   : > { %v632_v38 = vadd.f32 %v624_v28, %v604_v44  ;;  %v493_v49 = vadd.f32 %v485_v35, %v465_v45  ;;  %v626_v1 = vmul.f32 %v2689_v21, %v614_v14 }
  0xc4   : > { %v577_v54 = vadd.f32 %v569_v47, %v548_v51 }
  0xc5   : > { %2170 = vmatmul.mubr.msk.f32.gmra.mxu0 %vm267_vm0, %v632_v38  ;;  %v521_v13 = vadd.f32 %v513_v50, %v493_v49 }
  0xc6   : > { %v605_v57 = vadd.f32 %v597_v55, %v577_v54 }
  0xc7   : > { %v549_v60 = vadd.f32 %v541_v56, %v521_v13 }
  0xc8   : > { %v633_v62 = vadd.f32 %v625_v59, %v605_v57 }
  0xc9   : > { %v578_v58 = vadd.f32 %v570_v52, %v549_v60 }
  0xca   : > { %2172 = vmatprep.mubr.msk.f32.mxu0 %vm267_vm0, %v633_v62 }
  0xcb   : > { %v606_v0 = vadd.f32 %v598_v61, %v578_v58 }
  0xcd   : > { %v634_v3 = vadd.f32 %v626_v1, %v606_v0 }
  0xcf   : > { %2173 = vmatmul.mubr.msk.f32.gmra.mxu0 %vm267_vm0, %v634_v3 }
 0x174   : > { %v2165_v4 = vpop.f32.mrf.mxu0 }
 0x175   : > { %v2798_v20 = vadd.f32 %v2165_v4, %v1959_v63 }
 0x176   : > { %v744_v5 = vpop.f32.mrf.mxu0 }
 0x177   : > { %v2777_v6 = vadd.f32 %v1959_v63, %v744_v5 }
 0x179   : > { %2191 = vmatprep.mubr.msk.f32.mxu1 %vm807_vm4, %v2777_v6 }
 0x17d   : > { %v2168_v2 = vpop.f32.mrf.mxu0 }
 0x17e   : > { %v2792_v8 = vadd.f32 %v2168_v2, %v1959_v63 }
 0x17f   : > { %v754_v21 = vpop.f32.mrf.mxu0 }
 0x180   : > { %v2795_v9 = vadd.f32 %v1959_v63, %v754_v21 }
 0x185   : > { %v2171_v7 = vpop.f32.mrf.mxu0 }
 0x186   : > { %v2786_v17 = vadd.f32 %v2171_v7, %v1959_v63 }
 0x187   : > { %v764_v10 = vpop.f32.mrf.mxu0 }
 0x188   : > { %v2789_v19 = vadd.f32 %v1959_v63, %v764_v10 }
 0x18f   : > { %v2174_v11 = vpop.f32.mrf.mxu0 }
 0x190   : > { %v2781_v12 = vadd.f32 %v2174_v11, %v1959_v63 }
 0x191   : > { %v774_v15 = vpop.f32.mrf.mxu0 }
 0x192   : > { %v2783_v16 = vadd.f32 %v1959_v63, %v774_v15  ;;  %805 = vrot.lane.b32.xlu0 %v2781_v12, %s2454_s24 }
 0x194   : > { %803 = vrot.lane.b32.xlu1 %v2783_v16, %s2454_s24 }
 0x196   : > { %801 = vrot.lane.b32.xlu0 %v2786_v17, %s2454_s24 }
 0x198   : > { %799 = vrot.lane.b32.xlu1 %v2789_v19, %s2454_s24 }
 0x19a   : > { %797 = vrot.lane.b32.xlu0 %v2792_v8, %s2454_s24 }
 0x19c   : > { %795 = vrot.lane.b32.xlu1 %v2795_v9, %s2454_s24 }
 0x19e   : > { %793 = vrot.lane.b32.xlu0 %v2798_v20, %s2454_s24 }
 0x1a0   : > { %791 = vrot.lane.b32.xlu1 %v2777_v6, %s2454_s24 }
 0x1a2   : > { %1217 = vrot.lane.b32.xlu0 %v2781_v12, %s2455_s25 }
 0x1a4   : > { %1215 = vrot.lane.b32.xlu1 %v2783_v16, %s2455_s25 }
 0x1a6   : > { %1213 = vrot.lane.b32.xlu0 %v2786_v17, %s2455_s25 }
 0x1a8   : > { %1211 = vrot.lane.b32.xlu1 %v2789_v19, %s2455_s25 }
 0x1aa   : > { %1209 = vrot.lane.b32.xlu0 %v2792_v8, %s2455_s25 }
 0x1ac   : > { %1207 = vrot.lane.b32.xlu1 %v2795_v9, %s2455_s25 }
 0x1ae   : > { %1205 = vrot.lane.b32.xlu0 %v2798_v20, %s2455_s25 }
 0x1b0   : > { %1203 = vrot.lane.b32.xlu1 %v2777_v6, %s2455_s25 }
 0x1b2   : > { %1187 = vrot.lane.b32.xlu0 %v2777_v6, %s2456_s26 }
 0x1b4   : > { %1189 = vrot.lane.b32.xlu1 %v2798_v20, %s2456_s26 }
 0x1b6   : > { %1191 = vrot.lane.b32.xlu0 %v2795_v9, %s2456_s26 }
 0x1b8   : > { %1193 = vrot.lane.b32.xlu1 %v2792_v8, %s2456_s26 }
 0x1ba   : > { %1195 = vrot.lane.b32.xlu0 %v2789_v19, %s2456_s26 }
 0x1bc   : > { %1197 = vrot.lane.b32.xlu1 %v2786_v17, %s2456_s26 }
 0x1be   : > { %1199 = vrot.lane.b32.xlu0 %v2783_v16, %s2456_s26 }
 0x1c0   : > { %1201 = vrot.lane.b32.xlu1 %v2781_v12, %s2456_s26 }
 0x1c2   : > { %1043 = vrot.lane.b32.xlu0 %v2786_v17, %s2457_s27 }
 0x1c4   : > { %1047 = vrot.lane.b32.xlu1 %v2781_v12, %s2457_s27 }
 0x1c6   : > { %1039 = vrot.lane.b32.xlu0 %v2792_v8, %s2457_s27 }
 0x1c8   : > { %1041 = vrot.lane.b32.xlu1 %v2789_v19, %s2457_s27 }
 0x1ca   : > { %1037 = vrot.lane.b32.xlu0 %v2795_v9, %s2457_s27 }
 0x1cc   : > { %1035 = vrot.lane.b32.xlu1 %v2798_v20, %s2457_s27 }
 0x1ce   : > { %1045 = vrot.lane.b32.xlu0 %v2783_v16, %s2457_s27 }
 0x204   : > { %v806_v22 = vpop.permute.xlu0 %805 }
 0x205   : > { %2175 = vmatprep.subr.msk.mxu1 %vm807_vm4, %v806_v22 }
 0x206   : > { %2176 = vmatpush3.xpose.msk.msra.mxu1 %vm807_vm4, %v806_v22  ;;  %v804_v23 = vpop.permute.xlu1 %803 }
 0x207   : > { %2177 = vmatprep.subr.msk.mxu1 %vm807_vm4, %v804_v23 }
 0x208   : > { %v802_v24 = vpop.permute.xlu0 %801 }
 0x20a   : > { %2178 = vmatpush3.xpose.msk.msra.mxu1 %vm807_vm4, %v804_v23  ;;  %v800_v25 = vpop.permute.xlu1 %799 }
 0x20b   : > { %2179 = vmatprep.subr.msk.mxu1 %vm807_vm4, %v802_v24 }
 0x20c   : > { %v798_v26 = vpop.permute.xlu0 %797 }
 0x20e   : > { %2180 = vmatpush3.xpose.msk.msra.mxu1 %vm807_vm4, %v802_v24  ;;  %v796_v27 = vpop.permute.xlu1 %795 }
 0x20f   : > { %2181 = vmatprep.subr.msk.mxu1 %vm807_vm4, %v800_v25 }
 0x210   : > { %v794_v18 = vpop.permute.xlu0 %793 }
 0x212   : > { %2182 = vmatpush3.xpose.msk.msra.mxu1 %vm807_vm4, %v800_v25  ;;  %v792_v30 = vpop.permute.xlu1 %791 }
 0x213   : > { %2183 = vmatprep.subr.msk.mxu1 %vm807_vm4, %v798_v26 }
 0x214   : > { %v1218_v31 = vpop.permute.xlu0 %1217 }
 0x216   : > { %2184 = vmatpush3.xpose.msk.msra.mxu1 %vm807_vm4, %v798_v26  ;;  %v1216_v32 = vpop.permute.xlu1 %1215 }
 0x217   : > { %2185 = vmatprep.subr.msk.mxu1 %vm807_vm4, %v796_v27 }
 0x218   : > { %v1214_v33 = vpop.permute.xlu0 %1213 }
 0x21a   : > { %2186 = vmatpush3.xpose.msk.msra.mxu1 %vm807_vm4, %v796_v27  ;;  %v1212_v34 = vpop.permute.xlu1 %1211 }
 0x21b   : > { %2187 = vmatprep.subr.msk.mxu1 %vm807_vm4, %v794_v18 }
 0x21c   : > { %v1210_v35 = vpop.permute.xlu0 %1209 }
 0x21e   : > { %2188 = vmatpush3.xpose.msk.msra.mxu1 %vm807_vm4, %v794_v18  ;;  %v1208_v36 = vpop.permute.xlu1 %1207 }
 0x21f   : > { %2189 = vmatprep.subr.msk.mxu1 %vm807_vm4, %v792_v30 }
 0x220   : > { %v1206_v37 = vpop.permute.xlu0 %1205 }
 0x222   : > { %2190 = vmatpush3.xpose.msk.msra.mxu1 %vm807_vm4, %v792_v30  ;;  %v1204_v39 = vpop.permute.xlu1 %1203 }
 0x223   : > { %2231 = vmatprep.subr.msk.mxu1 %vm807_vm4, %v1218_v31 }
 0x224   : > { %v1188_v40 = vpop.permute.xlu0 %1187 }
 0x225   : > { %2192 = vmatmul.mubr.msk.f32.vlgmr.msra.gmra.mxu1 %vm807_vm4, %v2798_v20 }
 0x226   : > { %v1190_v28 = vpop.permute.xlu1 %1189  ;;  %2194 = vmatprep.mubr.msk.f32.mxu1 %vm807_vm4, %v2795_v9  ;;  %2232 = vmatpush3.xpose.msk.msra.mxu1 %vm807_vm4, %v1218_v31 }
 0x227   : > { %2233 = vmatprep.subr.msk.mxu1 %vm807_vm4, %v1216_v32 }
 0x228   : > { %v1192_v41 = vpop.permute.xlu0 %1191 }
 0x229   : > { %2195 = vmatmul.mubr.msk.f32.gmra.mxu1 %vm807_vm4, %v2792_v8 }
 0x22a   : > { %v1194_v42 = vpop.permute.xlu1 %1193  ;;  %2197 = vmatprep.mubr.msk.f32.mxu1 %vm807_vm4, %v2789_v19  ;;  %2234 = vmatpush3.xpose.msk.msra.mxu1 %vm807_vm4, %v1216_v32 }
 0x22b   : > { %2235 = vmatprep.subr.msk.mxu1 %vm807_vm4, %v1214_v33 }
 0x22c   : > { %v1196_v43 = vpop.permute.xlu0 %1195 }
 0x22d   : > { %2198 = vmatmul.mubr.msk.f32.gmra.mxu1 %vm807_vm4, %v2786_v17 }
 0x22e   : > { %v1198_v44 = vpop.permute.xlu1 %1197  ;;  %2200 = vmatprep.mubr.msk.f32.mxu1 %vm807_vm4, %v2783_v16  ;;  %2236 = vmatpush3.xpose.msk.msra.mxu1 %vm807_vm4, %v1214_v33 }
 0x22f   : > { %2237 = vmatprep.subr.msk.mxu1 %vm807_vm4, %v1212_v34 }
 0x230   : > { %v1200_v29 = vpop.permute.xlu0 %1199 }
 0x231   : > { %2201 = vmatmul.mubr.msk.f32.gmra.mxu1 %vm807_vm4, %v2781_v12 }
 0x232   : > { %v1202_v45 = vpop.permute.xlu1 %1201  ;;  %2238 = vmatpush3.xpose.msk.msra.mxu1 %vm807_vm4, %v1212_v34  ;;  %2247 = vmatprep.mubr.msk.f32.mxu1 %vm807_vm4, %v1188_v40 }
 0x233   : > { %2239 = vmatprep.subr.msk.mxu1 %vm807_vm4, %v1210_v35 }
 0x234   : > { %v1044_v46 = vpop.permute.xlu0 %1043 }
 0x236   : > { %v1048_v47 = vpop.permute.xlu1 %1047  ;;  %2240 = vmatpush3.xpose.msk.msra.mxu1 %vm807_vm4, %v1210_v35 }
 0x237   : > { %2203 = vmatprep.subr.mxu0 %v1048_v47  ;;  %2241 = vmatprep.subr.msk.mxu1 %vm807_vm4, %v1208_v36 }
 0x238   : > { %v1040_v48 = vpop.permute.xlu0 %1039  ;;  %2204 = vmatpush3.msra.mxu0 %v1048_v47 }
 0x23a   : > { %2242 = vmatpush3.xpose.msk.msra.mxu1 %vm807_vm4, %v1208_v36  ;;  %v1042_v49 = vpop.permute.xlu1 %1041 }
 0x23b   : > { %2243 = vmatprep.subr.msk.mxu1 %vm807_vm4, %v1206_v37 }
 0x23c   : > { %v1038_v38 = vpop.permute.xlu0 %1037 }
 0x23e   : > { %2244 = vmatpush3.xpose.msk.msra.mxu1 %vm807_vm4, %v1206_v37  ;;  %v1036_v50 = vpop.permute.xlu1 %1035 }
 0x23f   : > { %2245 = vmatprep.subr.msk.mxu1 %vm807_vm4, %v1204_v39 }
 0x240   : > { %v1046_v51 = vpop.permute.xlu0 %1045 }
 0x241   : > { %2205 = vmatprep.subr.mxu0 %v1046_v51 }
 0x242   : > { %2206 = vmatpush3.msra.mxu0 %v1046_v51  ;;  %2246 = vmatpush3.xpose.msk.msra.mxu1 %vm807_vm4, %v1204_v39 }
 0x243   : > { %2207 = vmatprep.subr.mxu0 %v1044_v46 }
 0x244   : > { %2208 = vmatpush3.msra.mxu0 %v1044_v46 }
 0x245   : > { %2209 = vmatprep.subr.mxu0 %v1042_v49  ;;  %2248 = vmatmul.mubr.msk.f32.vlgmr.msra.gmra.mxu1 %vm807_vm4, %v1190_v28 }
 0x246   : > { %2210 = vmatpush3.msra.mxu0 %v1042_v49  ;;  %2250 = vmatprep.mubr.msk.f32.mxu1 %vm807_vm4, %v1192_v41 }
 0x247   : > { %2211 = vmatprep.subr.mxu0 %v1040_v48 }
 0x248   : > { %2212 = vmatpush3.msra.mxu0 %v1040_v48 }
 0x249   : > { %2213 = vmatprep.subr.mxu0 %v1038_v38  ;;  %2251 = vmatmul.mubr.msk.f32.gmra.mxu1 %vm807_vm4, %v1194_v42 }
 0x24a   : > { %2214 = vmatpush3.msra.mxu0 %v1038_v38  ;;  %2253 = vmatprep.mubr.msk.f32.mxu1 %vm807_vm4, %v1196_v43 }
 0x24b   : > { %2215 = vmatprep.subr.mxu0 %v1036_v50 }
 0x24c   : > { %2216 = vmatpush3.msra.mxu0 %v1036_v50 }
 0x24d   : > { %2254 = vmatmul.mubr.msk.f32.gmra.mxu1 %vm807_vm4, %v1198_v44 }
 0x24e   : > { %2256 = vmatprep.mubr.msk.f32.mxu1 %vm807_vm4, %v1200_v29 }
 0x251   : > { %2257 = vmatmul.mubr.msk.f32.gmra.mxu1 %vm807_vm4, %v1202_v45 }
 0x2e5   : > { %v2193_v52 = vpop.f32.mrf.mxu1 }
 0x2e6   : > { %v948_v53 = vsel %vm362_vm3, %v2193_v52, -inf }
 0x2e7   : > { %949 = vmax.xlane.f32.xlu1 %v948_v53  ;;  %v906_v54 = vpop.f32.mrf.mxu1 }
 0x2e8   : > { %v945_v55 = vsel %vm362_vm3, %v906_v54, -inf }
 0x2e9   : > { %946 = vmax.xlane.f32.xlu0 %v945_v55  ;;  %v2196_v13 = vpop.f32.mrf.mxu1 }
 0x2ea   : > { %v954_v14 = vsel %vm362_vm3, %v2196_v13, -inf }
 0x2eb   : > { %v2889_v56 = vpop.f32.mrf.mxu1 }
 0x2ec   : > { %v951_v60 = vsel %vm362_vm3, %v2889_v56, -inf }
 0x2ed   : > { %955 = vmax.xlane.f32.xlu0 %v954_v14  ;;  %v2892_v57 = vpop.f32.mrf.mxu1 }
 0x2ee   : > { %v960_v1 = vsel %vm362_vm3, %v2892_v57, -inf }
 0x2ef   : > { %v926_v59 = vpop.f32.mrf.mxu1 }
 0x2f0   : > { %v957_v61 = vsel %vm362_vm3, %v926_v59, -inf }
 0x2f1   : > { %952 = vmax.xlane.f32.xlu0 %v951_v60  ;;  %958 = vmax.xlane.f32.xlu1 %v957_v61  ;;  %v2897_v62 = vpop.f32.mrf.mxu1 }
 0x2f2   : > { %v966_v3 = vsel %vm362_vm3, %v2897_v62, -inf }
 0x2f3   : > { %v2899_v58 = vpop.f32.mrf.mxu1 }
 0x2f4   : > { %v963_v0 = vsel %vm362_vm3, %v2899_v58, -inf }
 0x2f5   : > { %961 = vmax.xlane.f32.xlu0 %v960_v1  ;;  %964 = vmax.xlane.f32.xlu1 %v963_v0 }
 0x2f9   : > { %967 = vmax.xlane.f32.xlu0 %v966_v3 }
 0x305   : > { %v2907_v4 = vpop.f32.mrf.mxu1 }
 0x306   : > { %v1359_v63 = vsel %vm362_vm3, %v2907_v4, -inf }
 0x307   : > { %1360 = vmax.xlane.f32.xlu0 %v1359_v63  ;;  %v2911_v5 = vpop.f32.mrf.mxu1 }
 0x308   : > { %v1356_v2 = vsel %vm362_vm3, %v2911_v5, -inf }
 0x309   : > { %v2915_v21 = vpop.f32.mrf.mxu1  ;;  %1357 = vmax.xlane.f32.xlu1 %v1356_v2 }
 0x30a   : > { %v1365_v7 = vsel %vm362_vm3, %v2915_v21, -inf }
 0x30b   : > { %1366 = vmax.xlane.f32.xlu0 %v1365_v7  ;;  %v2919_v10 = vpop.f32.mrf.mxu1 }
 0x30c   : > { %v1362_v11 = vsel %vm362_vm3, %v2919_v10, -inf }
 0x30d   : > { %v2923_v15 = vpop.f32.mrf.mxu1  ;;  %1363 = vmax.xlane.f32.xlu1 %v1362_v11 }
 0x30e   : > { %v1371_v22 = vsel %vm362_vm3, %v2923_v15, -inf }
 0x30f   : > { %1372 = vmax.xlane.f32.xlu0 %v1371_v22  ;;  %v2927_v23 = vpop.f32.mrf.mxu1 }
 0x310   : > { %v1368_v24 = vsel %vm362_vm3, %v2927_v23, -inf }
 0x311   : > { %v2931_v25 = vpop.f32.mrf.mxu1  ;;  %1369 = vmax.xlane.f32.xlu1 %v1368_v24 }
 0x312   : > { %v1377_v26 = vsel %vm362_vm3, %v2931_v25, -inf }
 0x313   : > { %1378 = vmax.xlane.f32.xlu0 %v1377_v26  ;;  %v2935_v27 = vpop.f32.mrf.mxu1 }
 0x314   : > { %v1374_v18 = vsel %vm362_vm3, %v2935_v27, -inf }
 0x315   : > { %1375 = vmax.xlane.f32.xlu1 %v1374_v18 }
 0x326   : > { %1033 = vrot.lane.b32.xlu1 %v2777_v6, %s2457_s27 }
 0x329   : > { %1458 = vrot.lane.b32.xlu0 %v2781_v12, %s2458_s28 }
 0x32d   : > { %1456 = vrot.lane.b32.xlu0 %v2783_v16, %s2458_s28 }
 0x331   : > { %1454 = vrot.lane.b32.xlu0 %v2786_v17, %s2458_s28 }
 0x335   : > { %1452 = vrot.lane.b32.xlu0 %v2789_v19, %s2458_s28 }
 0x339   : > { %1450 = vrot.lane.b32.xlu0 %v2792_v8, %s2458_s28 }
 0x370   : > { %v950_v30 = vpop.xlane.xlu1 %949 }
 0x371   : > { %v970_v31 = vsub.f32 %v2193_v52, %v950_v30 }
 0x372   : > { %v947_v32 = vpop.xlane.xlu0 %946 }
 0x373   : > { %v979_v33 = vmul.f32 1.442695, %v970_v31  ;;  %v969_v34 = vsub.f32 %v906_v54, %v947_v32 }
 0x375   : > { %2346 = vpow2.f32 %v979_v33  ;;  %v977_v35 = vmul.f32 1.442695, %v969_v34 }
 0x376   : > { %v956_v12 = vpop.xlane.xlu0 %955 }
 0x377   : > { %2348 = vpow2.f32 %v977_v35  ;;  %v972_v36 = vsub.f32 %v2196_v13, %v956_v12 }
 0x379   : > { %v983_v16 = vmul.f32 1.442695, %v972_v36 }
 0x37a   : > { %v953_v37 = vpop.xlane.xlu0 %952  ;;  %v959_v39 = vpop.xlane.xlu1 %958 }
 0x37b   : > { %2350 = vpow2.f32 %v983_v16  ;;  %v971_v17 = vsub.f32 %v2889_v56, %v953_v37  ;;  %v973_v19 = vsub.f32 %v926_v59, %v959_v39 }
 0x37d   : > { %v981_v40 = vmul.f32 1.442695, %v971_v17  ;;  %v985_v28 = vmul.f32 1.442695, %v973_v19 }
 0x37e   : > { %v962_v8 = vpop.xlane.xlu0 %961  ;;  %v965_v41 = vpop.xlane.xlu1 %964 }
 0x37f   : > { %2352 = vpow2.f32 %v981_v40  ;;  %v974_v42 = vsub.f32 %v2892_v57, %v962_v8  ;;  %v975_v43 = vsub.f32 %v2899_v58, %v965_v41 }
 0x380   : > { %2354 = vpow2.f32 %v985_v28 }
 0x381   : > { %v987_v44 = vmul.f32 1.442695, %v974_v42  ;;  %v989_v29 = vmul.f32 1.442695, %v975_v43 }
 0x382   : > { %v2954_v45 = vpop.eup %2346  ;;  %v968_v46 = vpop.xlane.xlu0 %967 }
 0x383   : > { %2356 = vpow2.f32 %v987_v44  ;;  %v976_v47 = vsub.f32 %v2897_v62, %v968_v46  ;;  %v996_v48 = vsel %vm362_vm3, %v2954_v45, 0.0 }
 0x384   : > { %v2959_v38 = vpop.eup %2348  ;;  %2358 = vpow2.f32 %v989_v29  ;;  %997 = vadd.xlane.f32.xlu0 %v996_v48 }
 0x385   : > { %v991_v51 = vmul.f32 1.442695, %v976_v47  ;;  %v993_v49 = vsel %vm362_vm3, %v2959_v38, 0.0 }
 0x386   : > { %994 = vadd.xlane.f32.xlu1 %v993_v49 }
 0x387   : > { %2360 = vpow2.f32 %v991_v51 }
 0x388   : > { %v2963_v50 = vpop.eup %2350 }
 0x389   : > { %v1002_v52 = vsel %vm362_vm3, %v2963_v50, 0.0 }
 0x38a   : > { %1003 = vadd.xlane.f32.xlu0 %v1002_v52 }
 0x38c   : > { %v2967_v53 = vpop.eup %2352 }
 0x38d   : > { %v999_v54 = vsel %vm362_vm3, %v2967_v53, 0.0  ;;  %v2971_v55 = vpop.eup %2354 }
 0x38e   : > { %1000 = vadd.xlane.f32.xlu1 %v999_v54  ;;  %v1005_v60 = vsel %vm362_vm3, %v2971_v55, 0.0 }
 0x390   : > { %v2973_v13 = vpop.eup %2356  ;;  %v1361_v56 = vpop.xlane.xlu0 %1360 }
 0x391   : > { %v2975_v14 = vpop.eup %2358  ;;  %v1381_v57 = vsub.f32 %v2907_v4, %v1361_v56  ;;  %v1008_v59 = vsel %vm362_vm3, %v2973_v13, 0.0 }
 0x392   : > { %1009 = vadd.xlane.f32.xlu0 %v1008_v59  ;;  %1006 = vadd.xlane.f32.xlu1 %v1005_v60  ;;  %v1358_v61 = vpop.xlane.xlu1 %1357  ;;  %v1011_v3 = vsel %vm362_vm3, %v2975_v14, 0.0 }
 0x393   : > { %v1390_v62 = vmul.f32 1.442695, %v1381_v57  ;;  %v1380_v58 = vsub.f32 %v2911_v5, %v1358_v61 }
 0x394   : > { %v2983_v1 = vpop.eup %2360  ;;  %v1367_v0 = vpop.xlane.xlu0 %1366 }
 0x395   : > { %2362 = vpow2.f32 %v1390_v62  ;;  %v1388_v4 = vmul.f32 1.442695, %v1380_v58  ;;  %v1383_v63 = vsub.f32 %v2915_v21, %v1367_v0  ;;  %v1014_v2 = vsel %vm362_vm3, %v2983_v1, 0.0 }
 0x396   : > { %1015 = vadd.xlane.f32.xlu0 %v1014_v2  ;;  %1012 = vadd.xlane.f32.xlu1 %v1011_v3  ;;  %v1364_v7 = vpop.xlane.xlu1 %1363 }
 0x397   : > { %2364 = vpow2.f32 %v1388_v4  ;;  %v1394_v11 = vmul.f32 1.442695, %v1383_v63  ;;  %v1382_v5 = vsub.f32 %v2919_v10, %v1364_v7 }
 0x398   : > { %v1373_v22 = vpop.xlane.xlu0 %1372 }
 0x399   : > { %2366 = vpow2.f32 %v1394_v11  ;;  %v1392_v24 = vmul.f32 1.442695, %v1382_v5  ;;  %v1385_v26 = vsub.f32 %v2923_v15, %v1373_v22 }
 0x39a   : > { %v1370_v18 = vpop.xlane.xlu1 %1369 }
 0x39b   : > { %2368 = vpow2.f32 %v1392_v24  ;;  %v1398_v30 = vmul.f32 1.442695, %v1385_v26  ;;  %v1384_v21 = vsub.f32 %v2927_v23, %v1370_v18 }
 0x39c   : > { %v1379_v31 = vpop.xlane.xlu0 %1378 }
 0x39d   : > { %2370 = vpow2.f32 %v1398_v30  ;;  %v1396_v32 = vmul.f32 1.442695, %v1384_v21  ;;  %v1387_v33 = vsub.f32 %v2931_v25, %v1379_v31 }
 0x39e   : > { %v1376_v34 = vpop.xlane.xlu1 %1375 }
 0x39f   : > { %v1402_v35 = vmul.f32 1.442695, %v1387_v33  ;;  %2372 = vpow2.f32 %v1396_v32  ;;  %v1386_v43 = vsub.f32 %v2935_v27, %v1376_v34 }
 0x3a0   : > { %v1459_v16 = vpop.permute.xlu0 %1458 }
 0x3a1   : > { %2374 = vpow2.f32 %v1402_v35  ;;  %v1400_v44 = vmul.f32 1.442695, %v1386_v43 }
 0x3a2   : > { %v2994_v10 = vpop.eup %2362  ;;  %v1034_v12 = vpop.permute.xlu1 %1033 }
 0x3a3   : > { %2217 = vmatprep.subr.mxu0 %v1034_v12  ;;  %v1407_v15 = vsel %vm362_vm3, %v2994_v10, 0.0  ;;  %2376 = vpow2.f32 %v1400_v44 }
 0x3a4   : > { %v2998_v36 = vpop.eup %2364  ;;  %1408 = vadd.xlane.f32.xlu0 %v1407_v15  ;;  %2218 = vmatpush3.msra.mxu0 %v1034_v12  ;;  %v1457_v47 = vpop.permute.xlu0 %1456 }
 0x3a5   : > { %2259 = vmatprep.subr.mxu0 %v1459_v16  ;;  %v1404_v23 = vsel %vm362_vm3, %v2998_v36, 0.0 }
 0x3a6   : > { %v3002_v25 = vpop.eup %2366  ;;  %1405 = vadd.xlane.f32.xlu1 %v1404_v23 }
 0x3a7   : > { %v1413_v39 = vsel %vm362_vm3, %v3002_v25, 0.0 }
 0x3a8   : > { %v3004_v37 = vpop.eup %2368  ;;  %v1455_v48 = vpop.permute.xlu0 %1454 }
 0x3a9   : > { %v1410_v17 = vsel %vm362_vm3, %v3004_v37, 0.0 }
 0x3aa   : > { %v3010_v19 = vpop.eup %2370  ;;  %1414 = vadd.xlane.f32.xlu1 %v1413_v39  ;;  %1411 = vadd.xlane.f32.xlu0 %v1410_v17 }
 0x3ab   : > { %v1419_v28 = vsel %vm362_vm3, %v3010_v19, 0.0 }
 0x3ac   : > { %v3012_v40 = vpop.eup %2372  ;;  %v1453_v51 = vpop.permute.xlu0 %1452 }
 0x3ad   : > { %v1416_v42 = vsel %vm362_vm3, %v3012_v40, 0.0 }
 0x3ae   : > { %v3016_v8 = vpop.eup %2374  ;;  %1420 = vadd.xlane.f32.xlu0 %v1419_v28 }
 0x3af   : > { %v1425_v41 = vsel %vm362_vm3, %v3016_v8, 0.0 }
 0x3b0   : > { %1426 = vadd.xlane.f32.xlu1 %v1425_v41  ;;  %v3027_v29 = vpop.eup %2376 }
 0x3b1   : > { %v1422_v46 = vsel %vm362_vm3, %v3027_v29, 0.0 }
 0x3b2   : > { %1417 = vadd.xlane.f32.xlu0 %v1416_v42 }
 0x3c1   : > { %1448 = vrot.lane.b32.xlu1 %v2795_v9, %s2458_s28  ;;  %v1451_v9 = vpop.permute.xlu0 %1450 }
 0x3c8   : > { %1446 = vrot.lane.b32.xlu0 %v2798_v20, %s2458_s28 }
 0x3e7   : > { %1423 = vadd.xlane.f32.xlu0 %v1422_v46 }
 0x3fd   : > { %1444 = vrot.lane.b32.xlu0 %v2777_v6, %s2458_s28 }
 0x40d   : > { %v998_v49 = vpop.xlane.xlu0 %997 }
 0x40e   : > { %2378 = vrcp.f32 %v998_v49 }
 0x40f   : > { %v995_v20 = vpop.xlane.xlu1 %994 }
 0x410   : > { %2380 = vrcp.f32 %v995_v20 }
 0x413   : > { %v1004_v27 = vpop.xlane.xlu0 %1003 }
 0x414   : > { %2382 = vrcp.f32 %v1004_v27 }
 0x417   : > { %v1001_v52 = vpop.xlane.xlu1 %1000 }
 0x418   : > { %2384 = vrcp.f32 %v1001_v52 }
 0x41b   : > { %v1010_v54 = vpop.xlane.xlu0 %1009  ;;  %v1007_v56 = vpop.xlane.xlu1 %1006 }
 0x41c   : > { %v2379_v57 = vpop.eup %2378  ;;  %2386 = vrcp.f32 %v1010_v54 }
 0x41d   : > { %v2381_v59 = vpop.eup %2380  ;;  %2388 = vrcp.f32 %v1007_v56  ;;  %v1026_v6 = vmul.f32 %v2379_v57, %v2954_v45 }
 0x41e   : > { %v1025_v60 = vmul.f32 %v2381_v59, %v2959_v38 }
 0x41f   : > { %v1016_v61 = vpop.xlane.xlu0 %1015  ;;  %v1013_v62 = vpop.xlane.xlu1 %1012 }
 0x420   : > { %2390 = vrcp.f32 %v1016_v61  ;;  %2219 = vmatprep.mubr.msk.f32.mxu0 %vm362_vm3, %v1025_v60 }
 0x421   : > { %2392 = vrcp.f32 %v1013_v62  ;;  %2220 = vmatmul.mubr.msk.f32.vlgmr.msra.gmra.mxu0 %vm362_vm3, %v1026_v6  ;;  %v2383_v58 = vpop.eup %2382  ;;  %v2032_v62 = vld [vmem:[%s3115_s5] ss:$0 sm:$0xff] }
 0x422   : > { %2260 = vmatpush3.msra.mxu0 %v1459_v16  ;;  %v1028_v45 = vmul.f32 %v2383_v58, %v2963_v50  ;;  %v1598_v16 = vld [vmem:[#allocation3 + $0x8] sm:$0xff] }
 0x423   : > { %2261 = vmatprep.subr.mxu0 %v1457_v47 }
 0x424   : > { %2262 = vmatpush3.msra.mxu0 %v1457_v47 }
 0x425   : > { %v2385_v0 = vpop.eup %2384  ;;  %2263 = vmatprep.subr.mxu0 %v1455_v48 }
 0x426   : > { %2264 = vmatpush3.msra.mxu0 %v1455_v48  ;;  %v1027_v3 = vmul.f32 %v2385_v0, %v2967_v53 }
 0x427   : > { %2265 = vmatprep.subr.mxu0 %v1453_v51 }
 0x428   : > { %2266 = vmatpush3.msra.mxu0 %v1453_v51  ;;  %2222 = vmatprep.mubr.msk.f32.mxu0 %vm362_vm3, %v1027_v3 }
 0x429   : > { %v2387_v38 = vpop.eup %2386  ;;  %2267 = vmatprep.subr.mxu0 %v1451_v9  ;;  %2223 = vmatmul.mubr.msk.f32.gmra.mxu0 %vm362_vm3, %v1028_v45 }
 0x42a   : > { %v2389_v4 = vpop.eup %2388  ;;  %2268 = vmatpush3.msra.mxu0 %v1451_v9  ;;  %v1030_v63 = vmul.f32 %v2387_v38, %v2973_v13 }
 0x42b   : > { %v1029_v2 = vmul.f32 %v2389_v4, %v2971_v55 }
 0x42d   : > { %v2391_v7 = vpop.eup %2390  ;;  %2225 = vmatprep.mubr.msk.f32.mxu0 %vm362_vm3, %v1029_v2  ;;  %v1409_v11 = vpop.xlane.xlu0 %1408 }
 0x42e   : > { %v2393_v53 = vpop.eup %2392  ;;  %2226 = vmatmul.mubr.msk.f32.gmra.mxu0 %vm362_vm3, %v1030_v63  ;;  %v1032_v50 = vmul.f32 %v2391_v7, %v2983_v1 }
 0x42f   : > { %v1406_v5 = vpop.xlane.xlu1 %1405  ;;  %v1031_v22 = vmul.f32 %v2393_v53, %v2975_v14  ;;  %v1186_v14 = vld [vmem:[#allocation3] sm:$0xff] }
 0x430   : > { %2394 = vrcp.f32 %v1406_v5  ;;  %2315 = vmatprep.subr.mxu1 %v1186_v14 }
 0x431   : > { %2228 = vmatprep.mubr.msk.f32.mxu0 %vm362_vm3, %v1031_v22  ;;  %2396 = vrcp.f32 %v1409_v11  ;;  %2316 = vmatpush3.msra.mxu1 %v1186_v14 }
 0x432   : > { %2229 = vmatmul.mubr.msk.f32.gmra.mxu0 %vm362_vm3, %v1032_v50 }
 0x433   : > { %v1412_v13 = vpop.xlane.xlu0 %1411  ;;  %v1415_v24 = vpop.xlane.xlu1 %1414 }
 0x434   : > { %2398 = vrcp.f32 %v1412_v13 }
 0x435   : > { %2400 = vrcp.f32 %v1415_v24 }
 0x437   : > { %v1421_v55 = vpop.xlane.xlu0 %1420 }
 0x439   : > { %v1427_v26 = vpop.xlane.xlu1 %1426 }
 0x43b   : > { %v1418_v18 = vpop.xlane.xlu0 %1417 }
 0x43c   : > { %2402 = vrcp.f32 %v1418_v18 }
 0x43d   : > { %v2395_v30 = vpop.eup %2394  ;;  %v1449_v21 = vpop.permute.xlu1 %1448  ;;  %2404 = vrcp.f32 %v1421_v55 }
 0x43e   : > { %2269 = vmatprep.subr.mxu0 %v1449_v21  ;;  %v1436_v31 = vmul.f32 %v2395_v30, %v2998_v36  ;;  %2406 = vrcp.f32 %v1427_v26  ;;  %v2397_v33 = vpop.eup %2396 }
 0x43f   : > { %v1447_v1 = vpop.permute.xlu0 %1446  ;;  %2270 = vmatpush3.msra.mxu0 %v1449_v21  ;;  %v1437_v12 = vmul.f32 %v2397_v33, %v2994_v10 }
 0x440   : > { %2271 = vmatprep.subr.mxu0 %v1447_v1  ;;  %2275 = vmatprep.mubr.msk.f32.mxu0 %vm362_vm3, %v1436_v31 }
 0x441   : > { %2272 = vmatpush3.msra.mxu0 %v1447_v1  ;;  %v2399_v34 = vpop.eup %2398 }
 0x442   : > { %v2401_v15 = vpop.eup %2400  ;;  %v1438_v36 = vmul.f32 %v2399_v34, %v3004_v37 }
 0x443   : > { %v1439_v39 = vmul.f32 %v2401_v15, %v3002_v25 }
 0x449   : > { %v2403_v23 = vpop.eup %2402 }
 0x44a   : > { %v2405_v17 = vpop.eup %2404  ;;  %v1440_v28 = vmul.f32 %v2403_v23, %v3012_v40 }
 0x44b   : > { %v2407_v10 = vpop.eup %2406  ;;  %v1441_v37 = vmul.f32 %v2405_v17, %v3010_v19 }
 0x44c   : > { %v1443_v25 = vmul.f32 %v2407_v10, %v3016_v8 }
 0x470   : > { %v1424_v32 = vpop.xlane.xlu0 %1423 }
 0x471   : > { %2408 = vrcp.f32 %v1424_v32 }
 0x474   : > { %v1445_v35 = vpop.permute.xlu0 %1444 }
 0x475   : > { %2273 = vmatprep.subr.mxu0 %v1445_v35 }
 0x476   : > { %2274 = vmatpush3.msra.mxu0 %v1445_v35 }
 0x477   : > { %2276 = vmatmul.mubr.msk.f32.vlgmr.msra.gmra.mxu0 %vm362_vm3, %v1437_v12  ;;  %2287 = vmatprep.subr.mxu0 %v1598_v16 }
 0x478   : > { %2278 = vmatprep.mubr.msk.f32.mxu0 %vm362_vm3, %v1438_v36  ;;  %2288 = vmatpush3.msra.mxu0 %v1598_v16 }
 0x479   : > { %2301 = vmatprep.subr.mxu0 %v1186_v14 }
 0x47b   : > { %2279 = vmatmul.mubr.msk.f32.gmra.mxu0 %vm362_vm3, %v1439_v39 }
 0x47c   : > { %2281 = vmatprep.mubr.msk.f32.mxu0 %vm362_vm3, %v1440_v28 }
 0x47e   : > { %v2409_v41 = vpop.eup %2408 }
 0x47f   : > { %2282 = vmatmul.mubr.msk.f32.gmra.mxu0 %vm362_vm3, %v1441_v37  ;;  %v1442_v42 = vmul.f32 %v2409_v41, %v3027_v29 }
 0x481   : > { %2284 = vmatprep.mubr.msk.f32.mxu0 %vm362_vm3, %v1442_v42 }
 0x483   : > { %2285 = vmatmul.mubr.msk.f32.gmra.mxu0 %vm362_vm3, %v1443_v25 }
 0x4e1   : > { %v2221_v43 = vpop.f32.mrf.mxu0 }
 0x4e3   : > { %v1147_v40 = vpop.f32.mrf.mxu0 }
 0x4e9   : > { %v2224_v44 = vpop.f32.mrf.mxu0 }
 0x4eb   : > { %v1157_v46 = vpop.f32.mrf.mxu0 }
 0x4ec   : > { %2306 = vmatprep.mubr.msk.f32.mxu1 %vm807_vm4, %v1157_v46 }
 0x4ed   : > { %2307 = vmatmul.mubr.msk.f32.vlgmr.msra.gmra.mxu1 %vm807_vm4, %v2224_v44 }
 0x4ee   : > { %v2227_v19 = vpop.f32.mrf.mxu0 }
 0x4f0   : > { %v1167_v47 = vpop.f32.mrf.mxu0 }
 0x4f1   : > { %2309 = vmatprep.mubr.msk.f32.mxu1 %vm807_vm4, %v1167_v47 }
 0x4f2   : > { %v2230_v48 = vpop.f32.mrf.mxu0  ;;  %2310 = vmatmul.mubr.msk.f32.gmra.mxu1 %vm807_vm4, %v2227_v19 }
 0x4f4   : > { %v1177_v29 = vpop.f32.mrf.mxu0 }
 0x4f5   : > { %2312 = vmatprep.mubr.msk.f32.mxu1 %vm807_vm4, %v1177_v29 }
 0x4f6   : > { %2313 = vmatmul.mubr.msk.f32.gmra.mxu1 %vm807_vm4, %v2230_v48 }
 0x537   : > { %v2277_v8 = vpop.f32.mrf.mxu0 }
 0x539   : > { %v1558_v51 = vpop.f32.mrf.mxu0 }
 0x53a   : > { %2289 = vmatprep.mubr.msk.f32.mxu0 %vm807_vm4, %v1558_v51 }
 0x53b   : > { %v2280_v9 = vpop.f32.mrf.mxu0  ;;  %2290 = vmatmul.mubr.msk.f32.vlgmr.msra.gmra.mxu0 %vm807_vm4, %v2277_v8 }
 0x53c   : > { %2302 = vmatpush3.msra.mxu0 %v1186_v14 }
 0x53d   : > { %v1568_v49 = vpop.f32.mrf.mxu0 }
 0x53e   : > { %2292 = vmatprep.mubr.msk.f32.mxu0 %vm807_vm4, %v1568_v49 }
 0x53f   : > { %v2283_v20 = vpop.f32.mrf.mxu0  ;;  %2293 = vmatmul.mubr.msk.f32.gmra.mxu0 %vm807_vm4, %v2280_v9 }
 0x541   : > { %v1578_v27 = vpop.f32.mrf.mxu0 }
 0x542   : > { %2295 = vmatprep.mubr.msk.f32.mxu0 %vm807_vm4, %v1578_v27 }
 0x543   : > { %v2286_v52 = vpop.f32.mrf.mxu0  ;;  %2296 = vmatmul.mubr.msk.f32.gmra.mxu0 %vm807_vm4, %v2283_v20 }
 0x545   : > { %v1588_v54 = vpop.f32.mrf.mxu0 }
 0x546   : > { %2298 = vmatprep.mubr.msk.f32.mxu0 %vm807_vm4, %v1588_v54 }
 0x547   : > { %2299 = vmatmul.mubr.msk.f32.gmra.mxu0 %vm807_vm4, %v2286_v52 }
 0x548   : > { %2303 = vmatprep.mubr.msk.f32.mxu0 %vm807_vm4, %v1147_v40 }
 0x54b   : > { %2304 = vmatmul.mubr.msk.f32.vlgmr.msra.gmra.mxu0 %vm807_vm4, %v2221_v43 }
 0x5ad   : > { %v2308_v56 = vpop.f32.mrf.mxu1 }
 0x5af   : > { %v1828_v57 = vpop.f32.mrf.mxu1 }
 0x5b2   : > { %v2311_v60 = vpop.f32.mrf.mxu1 }
 0x5b4   : > { %v1838_v0 = vpop.f32.mrf.mxu1 }
 0x5b6   : > { %v2314_v7 = vpop.f32.mrf.mxu1 }
 0x5b8   : > { %v1848_v24 = vpop.f32.mrf.mxu1 }
 0x5fb   : > { %v2291_v59 = vpop.f32.mrf.mxu0 }
 0x5fd   : > { %v1689_v6 = vpop.f32.mrf.mxu0 }
 0x5ff   : > { %v2294_v61 = vpop.f32.mrf.mxu0 }
 0x600   : > { %v1834_v58 = vadd.f32 %v2308_v56, %v2294_v61 }
 0x601   : > { %v1699_v3 = vpop.f32.mrf.mxu0 }
 0x602   : > { %v1867_v45 = vadd.f32 %v2032_v62, %v1834_v58  ;;  %v1829_v38 = vadd.f32 %v1828_v57, %v1699_v3 }
 0x603   : > { %v2297_v4 = vpop.f32.mrf.mxu0 }
 0x604   : > { %1875 = vst.msk [vmem:[%s3089_s12 + $0x18] sm:$0xff] %vm353_vm2, %v1867_v45  ;;  %v1866_v63 = vadd.f32 %v2032_v62, %v1829_v38  ;;  %v1844_v2 = vadd.f32 %v2311_v60, %v2297_v4 }
 0x605   : > { %v1709_v53 = vpop.f32.mrf.mxu0 }
 0x606   : > { %1874 = vst.msk [vmem:[%s3089_s12 + $0x10] sm:$0xff] %vm353_vm2, %v1866_v63  ;;  %v1869_v50 = vadd.f32 %v2032_v62, %v1844_v2  ;;  %v1839_v11 = vadd.f32 %v1838_v0, %v1709_v53 }
 0x607   : > { %v2300_v5 = vpop.f32.mrf.mxu0 }
 0x608   : > { %1877 = vst.msk [vmem:[%s3089_s12 + $0x28] sm:$0xff] %vm353_vm2, %v1869_v50  ;;  %v1868_v22 = vadd.f32 %v2032_v62, %v1839_v11  ;;  %v1854_v13 = vadd.f32 %v2314_v7, %v2300_v5 }
 0x609   : > { %v1719_v55 = vpop.f32.mrf.mxu0 }
 0x60a   : > { %1876 = vst.msk [vmem:[%s3089_s12 + $0x20] sm:$0xff] %vm353_vm2, %v1868_v22  ;;  %v1871_v26 = vadd.f32 %v2032_v62, %v1854_v13  ;;  %v1849_v18 = vadd.f32 %v1848_v24, %v1719_v55 }
 0x60b   : > { %v2305_v30 = vpop.f32.mrf.mxu0 }
 0x60c   : > { %1879 = vst.msk [vmem:[%s3089_s12 + $0x38] sm:$0xff] %vm353_vm2, %v1871_v26  ;;  %v1870_v21 = vadd.f32 %v2032_v62, %v1849_v18  ;;  %v1824_v31 = vadd.f32 %v2305_v30, %v2291_v59 }
 0x60d   : > { %v1818_v1 = vpop.f32.mrf.mxu0 }
 0x60e   : > { %1878 = vst.msk [vmem:[%s3089_s12 + $0x30] sm:$0xff] %vm353_vm2, %v1870_v21  ;;  %v1865_v14 = vadd.f32 %v2032_v62, %v1824_v31  ;;  %v1819_v32 = vadd.f32 %v1818_v1, %v1689_v6 }
 0x610   : > { %1873 = vst.msk [vmem:[%s3089_s12 + $0x8] sm:$0xff] %vm353_vm2, %v1865_v14  ;;  %v1864_v33 = vadd.f32 %v2032_v62, %v1819_v32 }
 0x612   : > { %1872 = vst.msk [vmem:[%s3089_s12] sm:$0xff] %vm353_vm2, %v1864_v33 }
 0x613 PF: > { %s17_s21 = sadd.s32 1, %s2446_s21  }
 0x614   : > { %p14_p1 = scmp.ge.s32.totalorder %s17_s21, 4  }
 0x616   :  { %16 = sbr.rel (!%p14_p1) target bundleno = 1 (0x1), region = 82 }
 0x61b   :  { %1901 = vsyncpa [#allocation4], 1 }
 0x61c   :  { %1903 = vsyncpa [#allocation4 + $0x1], 1 }

</bundles_post_ra>
